<compile_context>
chip_gen: v7x
topology: tpu7x:2x2x1
jax: 0.10.0
libtpu: 0.0.40
codegen_flags: <defaults>
</compile_context>

<pallas_src>
import jax
import jax.numpy as jnp
from jax.experimental import pallas as pl
from jax.experimental.pallas import tpu as pltpu

# logical sizes (PyTorch module)
D_IN, H1, H2, LAT = 784, 400, 20, 2
# lane-padded sizes (multiples of 128)
D_IN_P, H1_P, H2_P, LAT_P = 896, 512, 128, 128


# ----------------------------------------------------------------------------
# kernel
# ----------------------------------------------------------------------------
def _vae_kernel(x_ref, eps_ref, w1, w2, w3, w4, w5, w6, b_ref,
                recon_ref, stats_ref):
    f32 = jnp.float32
    bf16 = jnp.bfloat16

    def mm(a, w_ref):
        # bf16 operands, f32 accumulation on the MXU
        return jnp.dot(a.astype(bf16), w_ref[...], preferred_element_type=f32)

    x = x_ref[...]                                             # (TB, 896) f32

    # ---------------- encoder ----------------
    h = jnp.maximum(mm(x, w1) + b_ref[0:1, :H1_P], 0.0)        # (TB, 512)
    h = jnp.maximum(mm(h, w2) + b_ref[1:2, :H2_P], 0.0)        # (TB, 128)
    # fused mu/log_var head: cols 0:2 = mu, cols 2:4 = log_var, rest = 0
    stats = mm(h, w3) + b_ref[2:3, :LAT_P]                     # (TB, 128)

    # ---------------- reparameterize ----------------
    mu = stats[:, 0:LAT]                                       # (TB, 2)
    log_var = stats[:, LAT:2 * LAT]                            # (TB, 2)
    z = mu + eps_ref[...] * jnp.exp(0.5 * log_var)             # (TB, 2)

    # ---------------- decoder ----------------
    d = jnp.maximum(mm(z, w4) + b_ref[3:4, :H2_P], 0.0)        # (TB, 128)
    d = jnp.maximum(mm(d, w5) + b_ref[4:5, :H1_P], 0.0)        # (TB, 512)
    d = mm(d, w6) + b_ref[5:6, :D_IN_P]                        # (TB, 896)

    recon_ref[...] = jax.nn.sigmoid(d)   # padded cols give sigmoid(0)=0.5, sliced off in wrapper
    stats_ref[...] = stats


# ----------------------------------------------------------------------------
# parameter init (PyTorch-style) and packing into lane-padded bf16 slabs
# ----------------------------------------------------------------------------
def _init_linear(key, fan_in, fan_out):
    kw, kb = jax.random.split(key)
    bound = 1.0 / jnp.sqrt(jnp.float32(fan_in))
    w = jax.random.uniform(kw, (fan_in, fan_out), jnp.float32, -bound, bound)
    b = jax.random.uniform(kb, (fan_out,), jnp.float32, -bound, bound)
    return w, b


def init_params(key):
    keys = jax.random.split(key, 7)
    dims = [(D_IN, H1), (H1, H2), (H2, LAT), (H2, LAT),
            (LAT, H2), (H2, H1), (H1, D_IN)]
    return [_init_linear(k, fi, fo) for k, (fi, fo) in zip(keys, dims)]


def pack_params(params):
    """Zero-pad weights to lane-aligned shapes (bf16), fuse mu/log_var heads,
    and pack all biases into one (8, 896) f32 slab."""
    (w1, b1), (w2, b2), (w31, b31), (w32, b32), (w4, b4), (w5, b5), (w6, b6) = params
    bf16 = jnp.bfloat16

    def pad(w, rows, cols):
        out = jnp.zeros((rows, cols), jnp.float32)
        return out.at[:w.shape[0], :w.shape[1]].set(w).astype(bf16)

    w1p = pad(w1, D_IN_P, H1_P)                    # (896, 512)
    w2p = pad(w2, H1_P, H2_P)                      # (512, 128)
    w3p = jnp.zeros((H2_P, LAT_P), jnp.float32)    # fused mu / log_var head
    w3p = w3p.at[:H2, 0:LAT].set(w31).at[:H2, LAT:2 * LAT].set(w32).astype(bf16)
    w4p = pad(w4, LAT, H2_P)                       # (2, 128)
    w5p = pad(w5, H2_P, H1_P)                      # (128, 512)
    w6p = pad(w6, H1_P, D_IN_P)                    # (512, 896)

    bias = jnp.zeros((8, D_IN_P), jnp.float32)
    bias = bias.at[0, :H1].set(b1)
    bias = bias.at[1, :H2].set(b2)
    bias = bias.at[2, 0:LAT].set(b31)
    bias = bias.at[2, LAT:2 * LAT].set(b32)
    bias = bias.at[3, :H2].set(b4)
    bias = bias.at[4, :H1].set(b5)
    bias = bias.at[5, :D_IN].set(b6)
    return (w1p, w2p, w3p, w4p, w5p, w6p, bias)


# ----------------------------------------------------------------------------
# wrapper
# ----------------------------------------------------------------------------
def _round_up(n, m):
    return ((n + m - 1) // m) * m


def encoder_decoder_forward(x_nchw, eps, packed, batch_tile=256):
    """x_nchw: (B, 1, 28, 28) f32, eps: (B, 2) f32. Returns (recon, mu, log_var)."""
    w1p, w2p, w3p, w4p, w5p, w6p, bias = packed
    B = x_nchw.shape[0]
    x = x_nchw.reshape(B, D_IN).astype(jnp.float32)

    tb = min(batch_tile, _round_up(B, 8))
    b_pad = _round_up(B, tb)

    x_p = jnp.zeros((b_pad, D_IN_P), jnp.float32).at[:B, :D_IN].set(x)
    eps_p = jnp.zeros((b_pad, LAT), jnp.float32).at[:B, :].set(eps)

    tile_map = lambda i: (i, 0)      # batch-tiled arrays
    resident = lambda i: (0, 0)      # weights/biases: same block every step -> stay in VMEM

    recon_p, stats = pl.pallas_call(
        _vae_kernel,
        out_shape=(
            jax.ShapeDtypeStruct((b_pad, D_IN_P), jnp.float32),
            jax.ShapeDtypeStruct((b_pad, LAT_P), jnp.float32),
        ),
        grid_spec=pltpu.PrefetchScalarGridSpec(
            num_scalar_prefetch=0,
            grid=(b_pad // tb,),
            in_specs=[
                pl.BlockSpec((tb, D_IN_P), tile_map),      # x tile
                pl.BlockSpec((tb, LAT), tile_map),         # eps tile
                pl.BlockSpec((D_IN_P, H1_P), resident),    # w1
                pl.BlockSpec((H1_P, H2_P), resident),      # w2
                pl.BlockSpec((H2_P, LAT_P), resident),     # w3 (fused mu/log_var)
                pl.BlockSpec((LAT, H2_P), resident),       # w4
                pl.BlockSpec((H2_P, H1_P), resident),      # w5
                pl.BlockSpec((H1_P, D_IN_P), resident),    # w6
                pl.BlockSpec((8, D_IN_P), resident),       # bias slab
            ],
            out_specs=(
                pl.BlockSpec((tb, D_IN_P), tile_map),      # recon (lane-dense 896)
                pl.BlockSpec((tb, LAT_P), tile_map),       # stats (lane-dense 128)
            ),
        ),
        compiler_params=pltpu.CompilerParams(
            dimension_semantics=("parallel",),   # shard batch tiles across TCs on v7x
            vmem_limit_bytes=16 << 20,           # sized from actual buffers (~8 MiB worst case)
        ),
    )(x_p, eps_p, w1p, w2p, w3p, w4p, w5p, w6p, bias)

    recon = recon_p[:B, :D_IN]
    mu = stats[:B, 0:LAT]
    log_var = stats[:B, LAT:2 * LAT]
    return recon, mu, log_var

# TODO(synk): for tiny batches invoked in a loop (v5e), keep the resident weights
# alive across calls via cross-pallas_call prefetch (P10) instead of re-fetching.


# ----------------------------------------------------------------------------
# references
# ----------------------------------------------------------------------------
def reference_forward_packed(x_nchw, eps, packed):
    """Pure-JAX reference mirroring the kernel's padded/bf16 numerics exactly."""
    w1p, w2p, w3p, w4p, w5p, w6p, bias = packed
    B = x_nchw.shape[0]
    x = jnp.zeros((B, D_IN_P), jnp.float32).at[:, :D_IN].set(x_nchw.reshape(B, D_IN))

    def mm(a, w):
        return jnp.dot(a.astype(jnp.bfloat16), w, preferred_element_type=jnp.float32)

    h = jax.nn.relu(mm(x, w1p) + bias[0:1, :H1_P])
    h = jax.nn.relu(mm(h, w2p) + bias[1:2, :H2_P])
    stats = mm(h, w3p) + bias[2:3, :LAT_P]
    mu = stats[:, 0:LAT]
    log_var = stats[:, LAT:2 * LAT]
    z = mu + eps * jnp.exp(0.5 * log_var)
    d = jax.nn.relu(mm(z, w4p) + bias[3:4, :H2_P])
    d = jax.nn.relu(mm(d, w5p) + bias[4:5, :H1_P])
    recon = jax.nn.sigmoid(mm(d, w6p) + bias[5:6, :D_IN_P])
    return recon[:, :D_IN], mu, log_var


def reference_forward_f32(x_nchw, eps, params):
    """Full-precision reference of the original PyTorch module (informational)."""
    (w1, b1), (w2, b2), (w31, b31), (w32, b32), (w4, b4), (w5, b5), (w6, b6) = params
    x = x_nchw.reshape(x_nchw.shape[0], D_IN)
    h = jax.nn.relu(x @ w1 + b1)
    h = jax.nn.relu(h @ w2 + b2)
    mu = h @ w31 + b31
    log_var = h @ w32 + b32
    z = mu + eps * jnp.exp(0.5 * log_var)
    d = jax.nn.relu(z @ w4 + b4)
    d = jax.nn.relu(d @ w5 + b5)
    recon = jax.nn.sigmoid(d @ w6 + b6)
    return recon, mu, log_var


if __name__ == "__main__":
    key = jax.random.PRNGKey(0)
    k_params, k_x, k_eps = jax.random.split(key, 3)

    B = 4
    params = init_params(k_params)
    packed = pack_params(params)
    x = jax.random.uniform(k_x, (B, 1, 28, 28), jnp.float32)   # MNIST-like NCHW
    eps = jax.random.normal(k_eps, (B, LAT), jnp.float32)      # reparameterization noise

    recon, mu, log_var = encoder_decoder_forward(x, eps, packed)
    jax.block_until_ready((recon, mu, log_var))

    assert recon.shape == (B, D_IN) and mu.shape == (B, LAT) and log_var.shape == (B, LAT)

    # tight check against a pure-JAX reference using the identical bf16/padded params
    r_ref, mu_ref, lv_ref = reference_forward_packed(x, eps, packed)
    assert jnp.allclose(recon, r_ref, atol=1e-3, rtol=1e-3)
    assert jnp.allclose(mu, mu_ref, atol=1e-3, rtol=1e-3)
    assert jnp.allclose(log_var, lv_ref, atol=1e-3, rtol=1e-3)

    # informational: drift vs full-f32 original-module math (bf16 weight quantization only)
    r32, mu32, lv32 = reference_forward_f32(x, eps, params)
    _max_drift = float(jnp.max(jnp.abs(recon - r32)))  # expected ~1e-2, not asserted

    print("KERNEL_OK")
</pallas_src>

<mosaic_0001>
module attributes {stable_mosaic.version = 11 : i64} {
  func.func @_vae_kernel(%arg0: i32, %arg1: memref<8x896xf32, #tpu.memory_space<vmem>>, %arg2: memref<8x2xf32, #tpu.memory_space<vmem>>, %arg3: memref<896x512xbf16, #tpu.memory_space<vmem>>, %arg4: memref<512x128xbf16, #tpu.memory_space<vmem>>, %arg5: memref<128x128xbf16, #tpu.memory_space<vmem>>, %arg6: memref<2x128xbf16, #tpu.memory_space<vmem>>, %arg7: memref<128x512xbf16, #tpu.memory_space<vmem>>, %arg8: memref<512x896xbf16, #tpu.memory_space<vmem>>, %arg9: memref<8x896xf32, #tpu.memory_space<vmem>>, %arg10: memref<8x896xf32, #tpu.memory_space<vmem>>, %arg11: memref<8x128xf32, #tpu.memory_space<vmem>>) attributes {dimension_semantics = [#tpu.dimension_semantics<parallel>], iteration_bounds = array<i64: 1>, scalar_prefetch = 0 : i64, scratch_operands = 0 : i64, tpu.core_type = #tpu.core_type<tc>, window_params = [{transform_indices = @transform_0, window_bounds = array<i64: 8, 896>}, {transform_indices = @transform_1, window_bounds = array<i64: 8, 2>}, {pipeline_mode = #tpu.pipeline_mode<synchronous>, transform_indices = @transform_2, window_bounds = array<i64: 896, 512>}, {pipeline_mode = #tpu.pipeline_mode<synchronous>, transform_indices = @transform_3, window_bounds = array<i64: 512, 128>}, {pipeline_mode = #tpu.pipeline_mode<synchronous>, transform_indices = @transform_4, window_bounds = array<i64: 128, 128>}, {pipeline_mode = #tpu.pipeline_mode<synchronous>, transform_indices = @transform_5, window_bounds = array<i64: 2, 128>}, {pipeline_mode = #tpu.pipeline_mode<synchronous>, transform_indices = @transform_6, window_bounds = array<i64: 128, 512>}, {pipeline_mode = #tpu.pipeline_mode<synchronous>, transform_indices = @transform_7, window_bounds = array<i64: 512, 896>}, {pipeline_mode = #tpu.pipeline_mode<synchronous>, transform_indices = @transform_8, window_bounds = array<i64: 8, 896>}, {transform_indices = @transform_9, window_bounds = array<i64: 8, 896>}, {transform_indices = @transform_10, window_bounds = array<i64: 8, 128>}]} {
    %c0 = arith.constant 0 : index
    %c0_0 = arith.constant 0 : index
    %0 = vector.load %arg1[%c0, %c0_0] : memref<8x896xf32, #tpu.memory_space<vmem>>, vector<8x896xf32>
    %1 = arith.truncf %0 : vector<8x896xf32> to vector<8x896xbf16>
    %c0_1 = arith.constant 0 : index
    %c0_2 = arith.constant 0 : index
    %2 = vector.load %arg3[%c0_1, %c0_2] : memref<896x512xbf16, #tpu.memory_space<vmem>>, vector<896x512xbf16>
    %cst = arith.constant dense<0.000000e+00> : vector<8x512xf32>
    %3 = tpu.matmul %1, %2, %cst {dimension_numbers = #tpu.dot_dimension_numbers<[1], [0], [0], [1], [0, 0, 1, 1], [], []>} : vector<8x896xbf16>, vector<896x512xbf16>, vector<8x512xf32> -> vector<8x512xf32>
    %c0_3 = arith.constant 0 : index
    %c0_4 = arith.constant 0 : index
    %4 = vector.load %arg9[%c0_3, %c0_4] : memref<8x896xf32, #tpu.memory_space<vmem>>, vector<1x512xf32>
    %5 = vector.broadcast %4 : vector<1x512xf32> to vector<8x512xf32>
    %6 = arith.addf %3, %5 : vector<8x512xf32>
    %cst_5 = arith.constant 0.000000e+00 : f32
    %7 = vector.broadcast %cst_5 : f32 to vector<8x512xf32>
    %8 = arith.maximumf %6, %7 : vector<8x512xf32>
    %9 = arith.truncf %8 : vector<8x512xf32> to vector<8x512xbf16>
    %c0_6 = arith.constant 0 : index
    %c0_7 = arith.constant 0 : index
    %10 = vector.load %arg4[%c0_6, %c0_7] : memref<512x128xbf16, #tpu.memory_space<vmem>>, vector<512x128xbf16>
    %cst_8 = arith.constant dense<0.000000e+00> : vector<8x128xf32>
    %11 = tpu.matmul %9, %10, %cst_8 {dimension_numbers = #tpu.dot_dimension_numbers<[1], [0], [0], [1], [0, 0, 1, 1], [], []>} : vector<8x512xbf16>, vector<512x128xbf16>, vector<8x128xf32> -> vector<8x128xf32>
    %c1 = arith.constant 1 : index
    %c0_9 = arith.constant 0 : index
    %12 = vector.load %arg9[%c1, %c0_9] : memref<8x896xf32, #tpu.memory_space<vmem>>, vector<1x128xf32>
    %13 = vector.broadcast %12 : vector<1x128xf32> to vector<8x128xf32>
    %14 = arith.addf %11, %13 : vector<8x128xf32>
    %cst_10 = arith.constant 0.000000e+00 : f32
    %15 = vector.broadcast %cst_10 : f32 to vector<8x128xf32>
    %16 = arith.maximumf %14, %15 : vector<8x128xf32>
    %17 = arith.truncf %16 : vector<8x128xf32> to vector<8x128xbf16>
    %c0_11 = arith.constant 0 : index
    %c0_12 = arith.constant 0 : index
    %18 = vector.load %arg5[%c0_11, %c0_12] : memref<128x128xbf16, #tpu.memory_space<vmem>>, vector<128x128xbf16>
    %cst_13 = arith.constant dense<0.000000e+00> : vector<8x128xf32>
    %19 = tpu.matmul %17, %18, %cst_13 {dimension_numbers = #tpu.dot_dimension_numbers<[1], [0], [0], [1], [0, 0, 1, 1], [], []>} : vector<8x128xbf16>, vector<128x128xbf16>, vector<8x128xf32> -> vector<8x128xf32>
    %c2 = arith.constant 2 : index
    %c0_14 = arith.constant 0 : index
    %20 = vector.load %arg9[%c2, %c0_14] : memref<8x896xf32, #tpu.memory_space<vmem>>, vector<1x128xf32>
    %21 = vector.broadcast %20 : vector<1x128xf32> to vector<8x128xf32>
    %22 = arith.addf %19, %21 : vector<8x128xf32>
    %23 = vector.extract_strided_slice %22 {offsets = [0, 0], sizes = [8, 2], strides = [1, 1]} : vector<8x128xf32> to vector<8x2xf32>
    %24 = vector.extract_strided_slice %22 {offsets = [0, 2], sizes = [8, 2], strides = [1, 1]} : vector<8x128xf32> to vector<8x2xf32>
    %c0_15 = arith.constant 0 : index
    %c0_16 = arith.constant 0 : index
    %25 = vector.load %arg2[%c0_15, %c0_16] : memref<8x2xf32, #tpu.memory_space<vmem>>, vector<8x2xf32>
    %cst_17 = arith.constant 5.000000e-01 : f32
    %26 = vector.broadcast %cst_17 : f32 to vector<8x2xf32>
    %27 = arith.mulf %26, %24 : vector<8x2xf32>
    %28 = math.exp %27 : vector<8x2xf32>
    %29 = arith.mulf %25, %28 : vector<8x2xf32>
    %30 = arith.addf %23, %29 : vector<8x2xf32>
    %31 = arith.truncf %30 : vector<8x2xf32> to vector<8x2xbf16>
    %c0_18 = arith.constant 0 : index
    %c0_19 = arith.constant 0 : index
    %32 = vector.load %arg6[%c0_18, %c0_19] : memref<2x128xbf16, #tpu.memory_space<vmem>>, vector<2x128xbf16>
    %cst_20 = arith.constant dense<0.000000e+00> : vector<8x128xf32>
    %33 = tpu.matmul %31, %32, %cst_20 {dimension_numbers = #tpu.dot_dimension_numbers<[1], [0], [0], [1], [0, 0, 1, 1], [], []>} : vector<8x2xbf16>, vector<2x128xbf16>, vector<8x128xf32> -> vector<8x128xf32>
    %c3 = arith.constant 3 : index
    %c0_21 = arith.constant 0 : index
    %34 = vector.load %arg9[%c3, %c0_21] : memref<8x896xf32, #tpu.memory_space<vmem>>, vector<1x128xf32>
    %35 = vector.broadcast %34 : vector<1x128xf32> to vector<8x128xf32>
    %36 = arith.addf %33, %35 : vector<8x128xf32>
    %cst_22 = arith.constant 0.000000e+00 : f32
    %37 = vector.broadcast %cst_22 : f32 to vector<8x128xf32>
    %38 = arith.maximumf %36, %37 : vector<8x128xf32>
    %39 = arith.truncf %38 : vector<8x128xf32> to vector<8x128xbf16>
    %c0_23 = arith.constant 0 : index
    %c0_24 = arith.constant 0 : index
    %40 = vector.load %arg7[%c0_23, %c0_24] : memref<128x512xbf16, #tpu.memory_space<vmem>>, vector<128x512xbf16>
    %cst_25 = arith.constant dense<0.000000e+00> : vector<8x512xf32>
    %41 = tpu.matmul %39, %40, %cst_25 {dimension_numbers = #tpu.dot_dimension_numbers<[1], [0], [0], [1], [0, 0, 1, 1], [], []>} : vector<8x128xbf16>, vector<128x512xbf16>, vector<8x512xf32> -> vector<8x512xf32>
    %c4 = arith.constant 4 : index
    %c0_26 = arith.constant 0 : index
    %42 = vector.load %arg9[%c4, %c0_26] : memref<8x896xf32, #tpu.memory_space<vmem>>, vector<1x512xf32>
    %43 = vector.broadcast %42 : vector<1x512xf32> to vector<8x512xf32>
    %44 = arith.addf %41, %43 : vector<8x512xf32>
    %cst_27 = arith.constant 0.000000e+00 : f32
    %45 = vector.broadcast %cst_27 : f32 to vector<8x512xf32>
    %46 = arith.maximumf %44, %45 : vector<8x512xf32>
    %47 = arith.truncf %46 : vector<8x512xf32> to vector<8x512xbf16>
    %c0_28 = arith.constant 0 : index
    %c0_29 = arith.constant 0 : index
    %48 = vector.load %arg8[%c0_28, %c0_29] : memref<512x896xbf16, #tpu.memory_space<vmem>>, vector<512x896xbf16>
    %cst_30 = arith.constant dense<0.000000e+00> : vector<8x896xf32>
    %49 = tpu.matmul %47, %48, %cst_30 {dimension_numbers = #tpu.dot_dimension_numbers<[1], [0], [0], [1], [0, 0, 1, 1], [], []>} : vector<8x512xbf16>, vector<512x896xbf16>, vector<8x896xf32> -> vector<8x896xf32>
    %c5 = arith.constant 5 : index
    %c0_31 = arith.constant 0 : index
    %50 = vector.load %arg9[%c5, %c0_31] : memref<8x896xf32, #tpu.memory_space<vmem>>, vector<1x896xf32>
    %51 = vector.broadcast %50 : vector<1x896xf32> to vector<8x896xf32>
    %52 = arith.addf %49, %51 : vector<8x896xf32>
    %53 = arith.negf %52 : vector<8x896xf32>
    %54 = math.exp %53 : vector<8x896xf32>
    %cst_32 = arith.constant 1.000000e+00 : f32
    %55 = vector.broadcast %cst_32 : f32 to vector<8x896xf32>
    %56 = arith.addf %55, %54 : vector<8x896xf32>
    %57 = arith.divf %55, %56 : vector<8x896xf32>
    %c0_33 = arith.constant 0 : index
    %c0_34 = arith.constant 0 : index
    %58 = vector.load %arg10[%c0_33, %c0_34] : memref<8x896xf32, #tpu.memory_space<vmem>>, vector<8x896xf32>
    tpu.vector_store %arg10[%c0_33, %c0_34], %57 {strides = array<i32>} : memref<8x896xf32, #tpu.memory_space<vmem>>, vector<8x896xf32>,
    %c0_35 = arith.constant 0 : index
    %c0_36 = arith.constant 0 : index
    %59 = vector.load %arg11[%c0_35, %c0_36] : memref<8x128xf32, #tpu.memory_space<vmem>>, vector<8x128xf32>
    tpu.vector_store %arg11[%c0_35, %c0_36], %22 {strides = array<i32>} : memref<8x128xf32, #tpu.memory_space<vmem>>, vector<8x128xf32>,
    return
  }
  func.func @transform_0(%arg0: i32) -> (i32, i32) {
    %c0_i32 = arith.constant 0 : i32
    %c0_i32_0 = arith.constant 0 : i32
    return %arg0, %c0_i32 : i32, i32
  }
  func.func @transform_1(%arg0: i32) -> (i32, i32) {
    %c0_i32 = arith.constant 0 : i32
    %c0_i32_0 = arith.constant 0 : i32
    return %arg0, %c0_i32 : i32, i32
  }
  func.func @transform_2(%arg0: i32) -> (i32, i32) {
    %c0_i32 = arith.constant 0 : i32
    %c0_i32_0 = arith.constant 0 : i32
    %c0_i32_1 = arith.constant 0 : i32
    return %c0_i32, %c0_i32_0 : i32, i32
  }
  func.func @transform_3(%arg0: i32) -> (i32, i32) {
    %c0_i32 = arith.constant 0 : i32
    %c0_i32_0 = arith.constant 0 : i32
    %c0_i32_1 = arith.constant 0 : i32
    return %c0_i32, %c0_i32_0 : i32, i32
  }
  func.func @transform_4(%arg0: i32) -> (i32, i32) {
    %c0_i32 = arith.constant 0 : i32
    %c0_i32_0 = arith.constant 0 : i32
    %c0_i32_1 = arith.constant 0 : i32
    return %c0_i32, %c0_i32_0 : i32, i32
  }
  func.func @transform_5(%arg0: i32) -> (i32, i32) {
    %c0_i32 = arith.constant 0 : i32
    %c0_i32_0 = arith.constant 0 : i32
    %c0_i32_1 = arith.constant 0 : i32
    return %c0_i32, %c0_i32_0 : i32, i32
  }
  func.func @transform_6(%arg0: i32) -> (i32, i32) {
    %c0_i32 = arith.constant 0 : i32
    %c0_i32_0 = arith.constant 0 : i32
    %c0_i32_1 = arith.constant 0 : i32
    return %c0_i32, %c0_i32_0 : i32, i32
  }
  func.func @transform_7(%arg0: i32) -> (i32, i32) {
    %c0_i32 = arith.constant 0 : i32
    %c0_i32_0 = arith.constant 0 : i32
    %c0_i32_1 = arith.constant 0 : i32
    return %c0_i32, %c0_i32_0 : i32, i32
  }
  func.func @transform_8(%arg0: i32) -> (i32, i32) {
    %c0_i32 = arith.constant 0 : i32
    %c0_i32_0 = arith.constant 0 : i32
    %c0_i32_1 = arith.constant 0 : i32
    return %c0_i32, %c0_i32_0 : i32, i32
  }
  func.func @transform_9(%arg0: i32) -> (i32, i32) {
    %c0_i32 = arith.constant 0 : i32
    %c0_i32_0 = arith.constant 0 : i32
    return %arg0, %c0_i32 : i32, i32
  }
  func.func @transform_10(%arg0: i32) -> (i32, i32) {
    %c0_i32 = arith.constant 0 : i32
    %c0_i32_0 = arith.constant 0 : i32
    return %arg0, %c0_i32 : i32, i32
  }
}

</mosaic_0001>

<bundles_post_ra>
// kernel: tpu_custom_call.1
= control target key start
LH: loop header
LB: loop body
LE: loop exit
PB: predicated region body
PF: predicated region fallthrough
CT: control target
= control target key end

     0   :  { %16 = vsyncpa [#allocation3], 0  ;;  %s6487_s0 = inlined_call_operand.hbm [shape: f32[8,896], index: 0, kind: input, shape index: {}]   ;;  %s6488_s1 = inlined_call_operand.vmem [shape: f32[8,2], index: 1, kind: input, shape index: {}]   ;;  %s6489_s2 = inlined_call_operand.hbm [shape: bf16[896,512], index: 2, kind: input, shape index: {}]   ;;  %s6490_s3 = inlined_call_operand.hbm [shape: bf16[512,128], index: 3, kind: input, shape index: {}]   ;;  %s6491_s4 = inlined_call_operand.hbm [shape: bf16[128,128], index: 4, kind: input, shape index: {}]   ;;  %s6492_s5 = inlined_call_operand.vmem [shape: bf16[2,128], index: 5, kind: input, shape index: {}]   ;;  %s6493_s6 = inlined_call_operand.hbm [shape: bf16[128,512], index: 6, kind: input, shape index: {}]   ;;  %s6494_s7 = inlined_call_operand.hbm [shape: bf16[512,896], index: 7, kind: input, shape index: {}]   ;;  %s6495_s8 = inlined_call_operand.hbm [shape: f32[8,896], index: 8, kind: input, shape index: {}]   ;;  %s6496_s9 = inlined_call_operand.hbm [shape: f32[8,896], index: 9, kind: output, shape index: {0}]   ;;  %s6497_s10 = inlined_call_operand.hbm [shape: f32[8,128], index: 10, kind: output, shape index: {1}]  }
   0x1   :  { %17 = vsyncpa [#allocation6], 0 }
   0x2   :  { %18 = vsyncpa [#allocation9], 0 }
   0x3   :  { %19 = vsyncpa [#allocation12], 0 }
   0x4   :  { %20 = vsyncpa [#allocation4], 0 }
   0x5   :  { %21 = vsyncpa [#allocation16], 0  ;;  %s6212_s13 = smov [#allocation5]   ;;  %s6002_s17 = scalar_lea.hbm %s6489_s2, 28672 }
   0x6   :  { %s39_s14 = sshll.u32 %s6212_s13, 4  ;;  %p6003_p0 = scmp.ne.s32.totalorder %s6489_s2, %s6002_s17  ;;  %s40_s14 = int_to_ptr.vmem [resolvable:$true] %s39_s14 }
   0x7   :  { %p6006_p1 = scmp.lt.u32.totalorder %s6002_s17, %s6489_s2 }
   0x9   :  { %p6008_p2 = pnand %p6006_p1, %p6003_p0 }
   0xb   :  { %6011 = shalt.err (!%p6008_p2)
}
   0xc   :  { %s6012_s22 = scalar_lea.vmem %s40_s14, 28672  ;;  %p6017_p4 = scmp.lt.s32.totalorder %s40_s14, %s40_s14 }
   0xd   :  { %p6013_p3 = scmp.ne.s32.totalorder %s40_s14, %s6012_s22  ;;  %p6018_p5 = scmp.lt.s32.totalorder %s6012_s22, %s6012_s22 }
   0xf   :  { %p6019_p6 = por %p6018_p5, %p6017_p4 }
  0x11   :  { %p6020_p7 = pnand %p6019_p6, %p6013_p3 }
  0x13   :  { %6023 = shalt.err (!%p6020_p7)
}
  0x14   :  { %s6213_s23 = smov 256   ;;  %s6214_s24 = smov 16  }
  0x15   :  { %45 = dma.hbm_to_vmem [thread:$0]  %s6489_s2, 28672, %s40_s14, [#allocation6], %s6213_s23, %s6213_s23, %s6214_s24  }
  0x16   :  { %s6215_s27 = smov [#allocation8]   ;;  %s6216_s29 = smov [#allocation11]  }
  0x17   :  { %s63_s28 = sshll.u32 %s6215_s27, 4  ;;  %s89_s30 = sshll.u32 %s6216_s29, 4  ;;  %s64_s28 = int_to_ptr.vmem [resolvable:$true] %s63_s28  ;;  %s90_s30 = int_to_ptr.vmem [resolvable:$true] %s89_s30 }
  0x18   :  { %s6024_s13 = scalar_lea.hbm %s6491_s4, 1024 }
  0x19   :  { %p6025_p8 = scmp.ne.s32.totalorder %s6491_s4, %s6024_s13  ;;  %p6028_p9 = scmp.lt.u32.totalorder %s6024_s13, %s6491_s4 }
  0x1b   :  { %p6030_p10 = pnand %p6028_p9, %p6025_p8 }
  0x1d   :  { %6033 = shalt.err (!%p6030_p10)
}
  0x1e   :  { %s6034_s2 = scalar_lea.vmem %s64_s28, 1024  ;;  %p6039_p12 = scmp.lt.s32.totalorder %s64_s28, %s64_s28 }
  0x1f   :  { %p6035_p11 = scmp.ne.s32.totalorder %s64_s28, %s6034_s2  ;;  %p6040_p13 = scmp.lt.s32.totalorder %s6034_s2, %s6034_s2 }
  0x21   :  { %p6041_p0 = por %p6040_p13, %p6039_p12 }
  0x23   :  { %p6042_p1 = pnand %p6041_p0, %p6035_p11 }
  0x25   :  { %6045 = shalt.err (!%p6042_p1)
}
  0x26   :  { %s6217_s14 = smov 64   ;;  %s6218_s19 = smov 4  }
  0x27   :  { %69 = dma.hbm_to_vmem [thread:$0]  %s6491_s4, 1024, %s64_s28, [#allocation9], %s6217_s14, %s6217_s14, %s6218_s19  }
  0x28   :  { %s6046_s26 = scalar_lea.hbm %s6494_s7, 28672 }
  0x29   :  { %p6047_p2 = scmp.ne.s32.totalorder %s6494_s7, %s6046_s26  ;;  %p6050_p3 = scmp.lt.u32.totalorder %s6046_s26, %s6494_s7 }
  0x2b   :  { %p6052_p4 = pnand %p6050_p3, %p6047_p2 }
  0x2d   :  { %6055 = shalt.err (!%p6052_p4)
}
  0x2e   :  { %s6056_s13 = scalar_lea.vmem %s90_s30, 28672  ;;  %p6061_p6 = scmp.lt.s32.totalorder %s90_s30, %s90_s30 }
  0x2f   :  { %p6057_p5 = scmp.ne.s32.totalorder %s90_s30, %s6056_s13  ;;  %p6062_p7 = scmp.lt.s32.totalorder %s6056_s13, %s6056_s13 }
  0x31   :  { %p6063_p8 = por %p6062_p7, %p6061_p6 }
  0x33   :  { %p6064_p9 = pnand %p6063_p8, %p6057_p5 }
  0x35   :  { %6067 = shalt.err (!%p6064_p9)
}
  0x36   :  { %s6219_s4 = smov 448   ;;  %s6220_s28 = smov 28  }
  0x37   :  { %95 = dma.hbm_to_vmem [thread:$0]  %s6494_s7, 28672, %s90_s30, [#allocation12], %s6219_s4, %s6219_s4, %s6220_s28  }
  0x38   :  { %s6221_s17 = smov [#allocation2]   ;;  %s6222_s2 = smov [#allocation7]  }
  0x39   :  { %s28_s18 = sshll.u32 %s6221_s17, 4  ;;  %s51_s20 = sshll.u32 %s6222_s2, 4  ;;  %s29_s18 = int_to_ptr.vmem [resolvable:$true] %s28_s18  ;;  %s52_s20 = int_to_ptr.vmem [resolvable:$true] %s51_s20 }
  0x3a   :  { %s6068_s25 = scalar_lea.hbm %s6487_s0, 896 }
  0x3b   :  { %p6069_p10 = scmp.ne.s32.totalorder %s6487_s0, %s6068_s25  ;;  %p6072_p11 = scmp.lt.u32.totalorder %s6068_s25, %s6487_s0 }
  0x3d   :  { %p6074_p12 = pnand %p6072_p11, %p6069_p10 }
  0x3f   :  { %6077 = shalt.err (!%p6074_p12)
}
  0x40   :  { %s6078_s7 = scalar_lea.vmem %s29_s18, 896  ;;  %p6083_p0 = scmp.lt.s32.totalorder %s29_s18, %s29_s18 }
  0x41   :  { %p6079_p13 = scmp.ne.s32.totalorder %s29_s18, %s6078_s7  ;;  %p6084_p1 = scmp.lt.s32.totalorder %s6078_s7, %s6078_s7 }
  0x43   :  { %p6085_p2 = por %p6084_p1, %p6083_p0 }
  0x45   :  { %p6086_p3 = pnand %p6085_p2, %p6079_p13 }
  0x47   :  { %6089 = shalt.err (!%p6086_p3)
}
  0x48   :  { %31 = dma.hbm_to_vmem [thread:$0]  %s6487_s0, 896, %s29_s18, [#allocation3]  }
  0x49   :  { %s6090_s28 = scalar_lea.hbm %s6490_s3, 4096 }
  0x4a   :  { %p6091_p4 = scmp.ne.s32.totalorder %s6490_s3, %s6090_s28  ;;  %p6094_p5 = scmp.lt.u32.totalorder %s6090_s28, %s6490_s3 }
  0x4c   :  { %p6096_p6 = pnand %p6094_p5, %p6091_p4 }
  0x4e   :  { %6099 = shalt.err (!%p6096_p6)
}
  0x4f   :  { %s6100_s21 = scalar_lea.vmem %s52_s20, 4096  ;;  %p6105_p8 = scmp.lt.s32.totalorder %s52_s20, %s52_s20 }
  0x50   :  { %p6101_p7 = scmp.ne.s32.totalorder %s52_s20, %s6100_s21  ;;  %p6106_p9 = scmp.lt.s32.totalorder %s6100_s21, %s6100_s21 }
  0x52   :  { %p6107_p10 = por %p6106_p9, %p6105_p8 }
  0x54   :  { %p6108_p11 = pnand %p6107_p10, %p6101_p7 }
  0x56   :  { %6111 = shalt.err (!%p6108_p11)
}
  0x57   :  { %57 = dma.hbm_to_vmem [thread:$0]  %s6490_s3, 4096, %s52_s20, [#allocation6], %s6217_s14, %s6217_s14, %s6218_s19  }
  0x58   :  { %s6223_s22 = smov [#allocation10]   ;;  %s6224_s26 = smov [#allocation13]  }
  0x59   :  { %s77_s25 = sshll.u32 %s6223_s22, 4  ;;  %s102_s27 = sshll.u32 %s6224_s26, 4  ;;  %s78_s25 = int_to_ptr.vmem [resolvable:$true] %s77_s25  ;;  %s103_s27 = int_to_ptr.vmem [resolvable:$true] %s102_s27 }
  0x5a   :  { %s6112_s7 = scalar_lea.hbm %s6493_s6, 4096 }
  0x5b   :  { %p6113_p12 = scmp.ne.s32.totalorder %s6493_s6, %s6112_s7  ;;  %p6116_p13 = scmp.lt.u32.totalorder %s6112_s7, %s6493_s6 }
  0x5d   :  { %p6118_p0 = pnand %p6116_p13, %p6113_p12 }
  0x5f   :  { %6121 = shalt.err (!%p6118_p0)
}
  0x60   :  { %s6122_s3 = scalar_lea.vmem %s78_s25, 4096  ;;  %p6127_p2 = scmp.lt.s32.totalorder %s78_s25, %s78_s25 }
  0x61   :  { %p6123_p1 = scmp.ne.s32.totalorder %s78_s25, %s6122_s3  ;;  %p6128_p3 = scmp.lt.s32.totalorder %s6122_s3, %s6122_s3 }
  0x63   :  { %p6129_p4 = por %p6128_p3, %p6127_p2 }
  0x65   :  { %p6130_p5 = pnand %p6129_p4, %p6123_p1 }
  0x67   :  { %6133 = shalt.err (!%p6130_p5)
}
  0x68   :  { %83 = dma.hbm_to_vmem [thread:$0]  %s6493_s6, 4096, %s78_s25, [#allocation9], %s6213_s23, %s6213_s23, %s6214_s24  }
  0x69   :  { %s6134_s15 = scalar_lea.hbm %s6495_s8, 896 }
  0x6a   :  { %p6135_p6 = scmp.ne.s32.totalorder %s6495_s8, %s6134_s15  ;;  %p6138_p7 = scmp.lt.u32.totalorder %s6134_s15, %s6495_s8 }
  0x6c   :  { %p6140_p8 = pnand %p6138_p7, %p6135_p6 }
  0x6e   :  { %6143 = shalt.err (!%p6140_p8)
}
  0x6f   :  { %s6144_s0 = scalar_lea.vmem %s103_s27, 896  ;;  %p6149_p10 = scmp.lt.s32.totalorder %s103_s27, %s103_s27 }
  0x70   :  { %p6145_p9 = scmp.ne.s32.totalorder %s103_s27, %s6144_s0  ;;  %p6150_p11 = scmp.lt.s32.totalorder %s6144_s0, %s6144_s0 }
  0x72   :  { %p6151_p12 = por %p6150_p11, %p6149_p10 }
  0x74   :  { %p6152_p13 = pnand %p6151_p12, %p6145_p9 }
  0x76   :  { %6155 = shalt.err (!%p6152_p13)
}
  0x77   :  { %105 = dma.hbm_to_vmem [thread:$0]  %s6495_s8, 896, %s103_s27, [#allocation12]  }
  0x78   :  { %6200 = dma.done.wait [#allocation3], 896  }
  0x79   :  { %6201 = vsyncadd [#allocation3], 4294966400 }
  0x7a   :  { %6202 = dma.done.wait [#allocation6], 32768  }
  0x7b   :  { %6203 = vsyncadd [#allocation6], 4294934528 }
  0x7c   :  { %6204 = dma.done.wait [#allocation9], 5120  }
  0x7d   :  { %6205 = vsyncadd [#allocation9], 4294962176 }
  0x7e   :  { %6206 = dma.done.wait [#allocation12], 29568  }
  0x7f   :  { %6207 = vsyncadd [#allocation12], 4294937728  ;;  %v5228_v0 = vld [vmem:[#allocation5 + $0x4] ss:$16 sps:$4 sm:$0xff]   ;;  %v5230_v1 = vld [vmem:[#allocation5 + $0xc] ss:$16 sps:$4 sm:$0xff]  }
  0x80   :  { %1508 = vmatprep.subr.bf16.mxu0 %v5228_v0  ;;  %v5232_v2 = vld [vmem:[#allocation5] ss:$16 sps:$4 sm:$0xff]   ;;  %v5233_v3 = vld [vmem:[#allocation5 + $0x8] ss:$16 sps:$4 sm:$0xff]   ;;  %1672 = vmatprep.subr.bf16.mxu1 %v5230_v1  ;;  %v5234_v4 = vld [vmem:[#allocation5 + $0x24] ss:$16 sps:$4 sm:$0xff]  }
  0x81   :  { %1509 = vmatpush1.bf16.msra.mxu0 %v5232_v2  ;;  %1673 = vmatpush1.bf16.msra.mxu1 %v5233_v3  ;;  %v5236_v5 = vld [vmem:[#allocation5 + $0x2c] ss:$16 sps:$4 sm:$0xff]   ;;  %v5238_v6 = vld [vmem:[#allocation5 + $0x20] ss:$16 sps:$4 sm:$0xff]   ;;  %v5239_v7 = vld [vmem:[#allocation5 + $0x28] ss:$16 sps:$4 sm:$0xff]  }
  0x82   :  { %1510 = vmatprep.subr.bf16.mxu0 %v5234_v4  ;;  %1674 = vmatprep.subr.bf16.mxu1 %v5236_v5  ;;  %v5240_v8 = vld [vmem:[#allocation5 + $0x44] ss:$16 sps:$4 sm:$0xff]   ;;  %v5242_v9 = vld [vmem:[#allocation5 + $0x4c] ss:$16 sps:$4 sm:$0xff]   ;;  %v5244_v10 = vld [vmem:[#allocation5 + $0x40] ss:$16 sps:$4 sm:$0xff]  }
  0x83   :  { %v5245_v11 = vld [vmem:[#allocation5 + $0x48] ss:$16 sps:$4 sm:$0xff]   ;;  %v5246_v12 = vld [vmem:[#allocation5 + $0x64] ss:$16 sps:$4 sm:$0xff]   ;;  %v5248_v13 = vld [vmem:[#allocation5 + $0x6c] ss:$16 sps:$4 sm:$0xff]  }
  0x84   :  { %v5250_v14 = vld [vmem:[#allocation5 + $0x60] ss:$16 sps:$4 sm:$0xff]   ;;  %v5251_v15 = vld [vmem:[#allocation5 + $0x68] ss:$16 sps:$4 sm:$0xff]   ;;  %v5252_v16 = vld [vmem:[#allocation5 + $0x84] ss:$16 sps:$4 sm:$0xff]  }
  0x85   :  { %1511 = vmatpush1.bf16.msra.mxu0 %v5238_v6  ;;  %1675 = vmatpush1.bf16.msra.mxu1 %v5239_v7  ;;  %v5254_v17 = vld [vmem:[#allocation5 + $0x8c] ss:$16 sps:$4 sm:$0xff]   ;;  %v5256_v18 = vld [vmem:[#allocation5 + $0x80] ss:$16 sps:$4 sm:$0xff]   ;;  %v5257_v19 = vld [vmem:[#allocation5 + $0x88] ss:$16 sps:$4 sm:$0xff]  }
  0x86   :  { %1512 = vmatprep.subr.bf16.mxu0 %v5240_v8  ;;  %1676 = vmatprep.subr.bf16.mxu1 %v5242_v9  ;;  %v5258_v20 = vld [vmem:[#allocation5 + $0xa4] ss:$16 sps:$4 sm:$0xff]   ;;  %v5260_v21 = vld [vmem:[#allocation5 + $0xac] ss:$16 sps:$4 sm:$0xff]   ;;  %v5262_v22 = vld [vmem:[#allocation5 + $0xa0] ss:$16 sps:$4 sm:$0xff]  }
  0x87   :  { %v5263_v23 = vld [vmem:[#allocation5 + $0xa8] ss:$16 sps:$4 sm:$0xff]   ;;  %v5264_v24 = vld [vmem:[#allocation5 + $0xc4] ss:$16 sps:$4 sm:$0xff]   ;;  %v5266_v25 = vld [vmem:[#allocation5 + $0xcc] ss:$16 sps:$4 sm:$0xff]  }
  0x88   :  { %v5268_v26 = vld [vmem:[#allocation5 + $0xc0] ss:$16 sps:$4 sm:$0xff]   ;;  %v5269_v27 = vld [vmem:[#allocation5 + $0xc8] ss:$16 sps:$4 sm:$0xff]   ;;  %v5270_v28 = vld [vmem:[#allocation5 + $0xe4] ss:$16 sps:$4 sm:$0xff]  }
  0x89   :  { %1513 = vmatpush1.bf16.msra.mxu0 %v5244_v10  ;;  %1677 = vmatpush1.bf16.msra.mxu1 %v5245_v11  ;;  %v5272_v29 = vld [vmem:[#allocation5 + $0xec] ss:$16 sps:$4 sm:$0xff]   ;;  %v5274_v30 = vld [vmem:[#allocation5 + $0xe0] ss:$16 sps:$4 sm:$0xff]   ;;  %v5275_v31 = vld [vmem:[#allocation5 + $0xe8] ss:$16 sps:$4 sm:$0xff]  }
  0x8a   :  { %1514 = vmatprep.subr.bf16.mxu0 %v5246_v12  ;;  %1678 = vmatprep.subr.bf16.mxu1 %v5248_v13  ;;  %v5276_v32 = vld [vmem:[#allocation5 + $0x104] ss:$16 sps:$4 sm:$0xff]   ;;  %v5278_v33 = vld [vmem:[#allocation5 + $0x10c] ss:$16 sps:$4 sm:$0xff]   ;;  %v5280_v34 = vld [vmem:[#allocation5 + $0x100] ss:$16 sps:$4 sm:$0xff]  }
  0x8b   :  { %v5281_v35 = vld [vmem:[#allocation5 + $0x108] ss:$16 sps:$4 sm:$0xff]   ;;  %v5282_v36 = vld [vmem:[#allocation5 + $0x124] ss:$16 sps:$4 sm:$0xff]   ;;  %v5284_v37 = vld [vmem:[#allocation5 + $0x12c] ss:$16 sps:$4 sm:$0xff]  }
  0x8c   :  { %v5286_v38 = vld [vmem:[#allocation5 + $0x120] ss:$16 sps:$4 sm:$0xff]   ;;  %v5287_v39 = vld [vmem:[#allocation5 + $0x128] ss:$16 sps:$4 sm:$0xff]   ;;  %v5288_v40 = vld [vmem:[#allocation5 + $0x144] ss:$16 sps:$4 sm:$0xff]  }
  0x8d   :  { %1515 = vmatpush1.bf16.msra.mxu0 %v5250_v14  ;;  %1679 = vmatpush1.bf16.msra.mxu1 %v5251_v15  ;;  %v5290_v41 = vld [vmem:[#allocation5 + $0x14c] ss:$16 sps:$4 sm:$0xff]   ;;  %v5292_v42 = vld [vmem:[#allocation5 + $0x140] ss:$16 sps:$4 sm:$0xff]   ;;  %v5293_v43 = vld [vmem:[#allocation5 + $0x148] ss:$16 sps:$4 sm:$0xff]  }
  0x8e   :  { %1516 = vmatprep.subr.bf16.mxu0 %v5252_v16  ;;  %1680 = vmatprep.subr.bf16.mxu1 %v5254_v17  ;;  %v5294_v44 = vld [vmem:[#allocation5 + $0x164] ss:$16 sps:$4 sm:$0xff]   ;;  %v5296_v45 = vld [vmem:[#allocation5 + $0x16c] ss:$16 sps:$4 sm:$0xff]   ;;  %v5298_v47 = vld [vmem:[#allocation5 + $0x160] ss:$16 sps:$4 sm:$0xff]  }
  0x8f   :  { %v129_v46 = vld [vmem:[#allocation2 + $0x8] sm:$0xff]  ;;  %v5299_v49 = vld [vmem:[#allocation5 + $0x168] ss:$16 sps:$4 sm:$0xff]   ;;  %v5302_v51 = vld [vmem:[#allocation5 + $0x18c] ss:$16 sps:$4 sm:$0xff]   ;;  %vm6227_vm0 = vmmov 0  }
  0x90   :  { %v136_v48 = vpack.c.bf16 %v129_v46, %v129_v46  ;;  %v5300_v50 = vld [vmem:[#allocation5 + $0x184] ss:$16 sps:$4 sm:$0xff]   ;;  %v5304_v52 = vld [vmem:[#allocation5 + $0x180] ss:$16 sps:$4 sm:$0xff]   ;;  %v5305_v53 = vld [vmem:[#allocation5 + $0x188] ss:$16 sps:$4 sm:$0xff]  }
  0x91   :  { %1517 = vmatpush1.bf16.msra.mxu0 %v5256_v18  ;;  %1681 = vmatpush1.bf16.msra.mxu1 %v5257_v19  ;;  %v5306_v54 = vld [vmem:[#allocation5 + $0x1a4] ss:$16 sps:$4 sm:$0xff]   ;;  %v5308_v55 = vld [vmem:[#allocation5 + $0x1ac] ss:$16 sps:$4 sm:$0xff]   ;;  %v5310_v56 = vld [vmem:[#allocation5 + $0x1a0] ss:$16 sps:$4 sm:$0xff]  }
  0x92   :  { %1518 = vmatprep.subr.bf16.mxu0 %v5258_v20  ;;  %1682 = vmatprep.subr.bf16.mxu1 %v5260_v21  ;;  %v5311_v57 = vld [vmem:[#allocation5 + $0x1a8] ss:$16 sps:$4 sm:$0xff]   ;;  %v5312_v58 = vld [vmem:[#allocation5 + $0x1c4] ss:$16 sps:$4 sm:$0xff]   ;;  %v5314_v59 = vld [vmem:[#allocation5 + $0x1cc] ss:$16 sps:$4 sm:$0xff]  }
  0x93   :  { %1540 = vmatprep.mubr.bf16.mxu0 %v136_v48  ;;  %1704 = vmatprep.mubr.bf16.mxu1 %v136_v48  ;;  %v5316_v60 = vld [vmem:[#allocation5 + $0x1c0] ss:$16 sps:$4 sm:$0xff]   ;;  %v5317_v61 = vld [vmem:[#allocation5 + $0x1c8] ss:$16 sps:$4 sm:$0xff]   ;;  %v5318_v62 = vld [vmem:[#allocation5 + $0x1e4] ss:$16 sps:$4 sm:$0xff]  }
  0x94   :  { %v5320_v63 = vld [vmem:[#allocation5 + $0x1ec] ss:$16 sps:$4 sm:$0xff]   ;;  %v5322_v0 = vld [vmem:[#allocation5 + $0x1e0] ss:$16 sps:$4 sm:$0xff]   ;;  %v5323_v1 = vld [vmem:[#allocation5 + $0x1e8] ss:$16 sps:$4 sm:$0xff]  }
  0x95   :  { %1519 = vmatpush1.bf16.msra.mxu0 %v5262_v22  ;;  %1683 = vmatpush1.bf16.msra.mxu1 %v5263_v23  ;;  %v128_v2 = vld [vmem:[#allocation2] sm:$0xff]  ;;  %v5326_v3 = vld [vmem:[#allocation5 + $0x204] ss:$16 sps:$4 sm:$0xff]   ;;  %v5324_v6 = vld [vmem:[#allocation5 + $0x200] ss:$16 sps:$4 sm:$0xff]   ;;  %vm2305_vm1 = vcmask 1040384  }
  0x96   :  { %1520 = vmatprep.subr.bf16.mxu0 %v5264_v24  ;;  %1684 = vmatprep.subr.bf16.mxu1 %v5266_v25  ;;  %v5329_v4 = vld [vmem:[#allocation5 + $0x20c] ss:$16 sps:$4 sm:$0xff]   ;;  %v135_v5 = vpack.c.bf16 %v128_v2, %v128_v2  ;;  %v5327_v7 = vld [vmem:[#allocation5 + $0x208] ss:$16 sps:$4 sm:$0xff]   ;;  %v5332_v8 = vld [vmem:[#allocation5 + $0x224] ss:$16 sps:$4 sm:$0xff]  }
  0x97   :  { %v5335_v9 = vld [vmem:[#allocation5 + $0x22c] ss:$16 sps:$4 sm:$0xff]   ;;  %v5330_v10 = vld [vmem:[#allocation5 + $0x220] ss:$16 sps:$4 sm:$0xff]   ;;  %v5333_v11 = vld [vmem:[#allocation5 + $0x228] ss:$16 sps:$4 sm:$0xff]  }
  0x98   :  { %v5338_v12 = vld [vmem:[#allocation5 + $0x244] ss:$16 sps:$4 sm:$0xff]   ;;  %v5341_v13 = vld [vmem:[#allocation5 + $0x24c] ss:$16 sps:$4 sm:$0xff]   ;;  %v5336_v14 = vld [vmem:[#allocation5 + $0x240] ss:$16 sps:$4 sm:$0xff]  }
  0x99   :  { %1521 = vmatpush1.bf16.msra.mxu0 %v5268_v26  ;;  %1685 = vmatpush1.bf16.msra.mxu1 %v5269_v27  ;;  %v5339_v15 = vld [vmem:[#allocation5 + $0x248] ss:$16 sps:$4 sm:$0xff]   ;;  %v5344_v16 = vld [vmem:[#allocation5 + $0x264] ss:$16 sps:$4 sm:$0xff]   ;;  %v5347_v17 = vld [vmem:[#allocation5 + $0x26c] ss:$16 sps:$4 sm:$0xff]  }
  0x9a   :  { %1522 = vmatprep.subr.bf16.mxu0 %v5270_v28  ;;  %1686 = vmatprep.subr.bf16.mxu1 %v5272_v29  ;;  %v5342_v18 = vld [vmem:[#allocation5 + $0x260] ss:$16 sps:$4 sm:$0xff]   ;;  %v5345_v19 = vld [vmem:[#allocation5 + $0x268] ss:$16 sps:$4 sm:$0xff]   ;;  %v5350_v20 = vld [vmem:[#allocation5 + $0x284] ss:$16 sps:$4 sm:$0xff]  }
  0x9b   :  { %v5353_v21 = vld [vmem:[#allocation5 + $0x28c] ss:$16 sps:$4 sm:$0xff]   ;;  %v5348_v22 = vld [vmem:[#allocation5 + $0x280] ss:$16 sps:$4 sm:$0xff]   ;;  %v5351_v23 = vld [vmem:[#allocation5 + $0x288] ss:$16 sps:$4 sm:$0xff]  }
  0x9c   :  { %v5356_v24 = vld [vmem:[#allocation5 + $0x2a4] ss:$16 sps:$4 sm:$0xff]   ;;  %v5359_v25 = vld [vmem:[#allocation5 + $0x2ac] ss:$16 sps:$4 sm:$0xff]   ;;  %v5354_v26 = vld [vmem:[#allocation5 + $0x2a0] ss:$16 sps:$4 sm:$0xff]  }
  0x9d   :  { %1523 = vmatpush1.bf16.msra.mxu0 %v5274_v30  ;;  %1687 = vmatpush1.bf16.msra.mxu1 %v5275_v31  ;;  %v5357_v27 = vld [vmem:[#allocation5 + $0x2a8] ss:$16 sps:$4 sm:$0xff]   ;;  %v5362_v28 = vld [vmem:[#allocation5 + $0x2c4] ss:$16 sps:$4 sm:$0xff]   ;;  %v5365_v29 = vld [vmem:[#allocation5 + $0x2cc] ss:$16 sps:$4 sm:$0xff]  }
  0x9e   :  { %1524 = vmatprep.subr.bf16.mxu0 %v5276_v32  ;;  %1688 = vmatprep.subr.bf16.mxu1 %v5278_v33  ;;  %v131_v30 = vld [vmem:[#allocation2 + $0x18] sm:$0xff]  ;;  %v5363_v33 = vld [vmem:[#allocation5 + $0x2c8] ss:$16 sps:$4 sm:$0xff]   ;;  %vm2301_vm2 = vcmask 15360  }
  0x9f   :  { %v5360_v31 = vld [vmem:[#allocation5 + $0x2c0] ss:$16 sps:$4 sm:$0xff]   ;;  %v138_v32 = vpack.c.bf16 %v131_v30, %v131_v30  ;;  %v5386_v46 = vld [vmem:[#allocation5 + $0x344] ss:$16 sps:$4 sm:$0xff]  }
  0xa0   :  { %v5384_v48 = vld [vmem:[#allocation5 + $0x340] ss:$16 sps:$4 sm:$0xff]   ;;  %v5416_v2 = vld [vmem:[#allocation5 + $0x3e4] ss:$16 sps:$4 sm:$0xff]  }
  0xa1   :  { %1525 = vmatpush1.bf16.msra.mxu0 %v5280_v34  ;;  %1689 = vmatpush1.bf16.msra.mxu1 %v5281_v35  ;;  %v5368_v34 = vld [vmem:[#allocation5 + $0x2e4] ss:$16 sps:$4 sm:$0xff]   ;;  %v5371_v35 = vld [vmem:[#allocation5 + $0x2ec] ss:$16 sps:$4 sm:$0xff]  }
  0xa2   :  { %1526 = vmatprep.subr.bf16.mxu0 %v5282_v36  ;;  %1690 = vmatprep.subr.bf16.mxu1 %v5284_v37  ;;  %v5366_v36 = vld [vmem:[#allocation5 + $0x2e0] ss:$16 sps:$4 sm:$0xff]   ;;  %v5369_v37 = vld [vmem:[#allocation5 + $0x2e8] ss:$16 sps:$4 sm:$0xff]   ;;  %v5452_v30 = vld [vmem:[#allocation5 + $0x4a4] ss:$16 sps:$4 sm:$0xff]  }
  0xa5   :  { %1527 = vmatpush1.bf16.msra.mxu0 %v5286_v38  ;;  %1691 = vmatpush1.bf16.msra.mxu1 %v5287_v39  ;;  %v5374_v38 = vld [vmem:[#allocation5 + $0x304] ss:$16 sps:$4 sm:$0xff]   ;;  %v5377_v39 = vld [vmem:[#allocation5 + $0x30c] ss:$16 sps:$4 sm:$0xff]  }
  0xa6   :  { %1528 = vmatprep.subr.bf16.mxu0 %v5288_v40  ;;  %1692 = vmatprep.subr.bf16.mxu1 %v5290_v41  ;;  %v5372_v40 = vld [vmem:[#allocation5 + $0x300] ss:$16 sps:$4 sm:$0xff]   ;;  %v5375_v41 = vld [vmem:[#allocation5 + $0x308] ss:$16 sps:$4 sm:$0xff]  }
  0xa9   :  { %1529 = vmatpush1.bf16.msra.mxu0 %v5292_v42  ;;  %1693 = vmatpush1.bf16.msra.mxu1 %v5293_v43  ;;  %v5380_v42 = vld [vmem:[#allocation5 + $0x324] ss:$16 sps:$4 sm:$0xff]   ;;  %v5383_v43 = vld [vmem:[#allocation5 + $0x32c] ss:$16 sps:$4 sm:$0xff]  }
  0xaa   :  { %1530 = vmatprep.subr.bf16.mxu0 %v5294_v44  ;;  %1694 = vmatprep.subr.bf16.mxu1 %v5296_v45  ;;  %v5378_v44 = vld [vmem:[#allocation5 + $0x320] ss:$16 sps:$4 sm:$0xff]   ;;  %v5381_v45 = vld [vmem:[#allocation5 + $0x328] ss:$16 sps:$4 sm:$0xff]  }
  0xad   :  { %1531 = vmatpush1.bf16.msra.mxu0 %v5298_v47  ;;  %1695 = vmatpush1.bf16.msra.mxu1 %v5299_v49  ;;  %v5389_v47 = vld [vmem:[#allocation5 + $0x34c] ss:$16 sps:$4 sm:$0xff]   ;;  %v5387_v49 = vld [vmem:[#allocation5 + $0x348] ss:$16 sps:$4 sm:$0xff]  }
  0xae   :  { %1532 = vmatprep.subr.bf16.mxu0 %v5300_v50  ;;  %1696 = vmatprep.subr.bf16.mxu1 %v5302_v51  ;;  %v5392_v50 = vld [vmem:[#allocation5 + $0x364] ss:$16 sps:$4 sm:$0xff]   ;;  %v5395_v51 = vld [vmem:[#allocation5 + $0x36c] ss:$16 sps:$4 sm:$0xff]  }
  0xb1   :  { %1533 = vmatpush1.bf16.msra.mxu0 %v5304_v52  ;;  %1697 = vmatpush1.bf16.msra.mxu1 %v5305_v53  ;;  %v5390_v52 = vld [vmem:[#allocation5 + $0x360] ss:$16 sps:$4 sm:$0xff]   ;;  %v5393_v53 = vld [vmem:[#allocation5 + $0x368] ss:$16 sps:$4 sm:$0xff]  }
  0xb2   :  { %1534 = vmatprep.subr.bf16.mxu0 %v5306_v54  ;;  %1698 = vmatprep.subr.bf16.mxu1 %v5308_v55  ;;  %v5398_v54 = vld [vmem:[#allocation5 + $0x384] ss:$16 sps:$4 sm:$0xff]   ;;  %v5401_v55 = vld [vmem:[#allocation5 + $0x38c] ss:$16 sps:$4 sm:$0xff]  }
  0xb5   :  { %1535 = vmatpush1.bf16.msra.mxu0 %v5310_v56  ;;  %1699 = vmatpush1.bf16.msra.mxu1 %v5311_v57  ;;  %v5396_v56 = vld [vmem:[#allocation5 + $0x380] ss:$16 sps:$4 sm:$0xff]   ;;  %v5399_v57 = vld [vmem:[#allocation5 + $0x388] ss:$16 sps:$4 sm:$0xff]  }
  0xb6   :  { %1536 = vmatprep.subr.bf16.mxu0 %v5312_v58  ;;  %1700 = vmatprep.subr.bf16.mxu1 %v5314_v59  ;;  %v5404_v58 = vld [vmem:[#allocation5 + $0x3a4] ss:$16 sps:$4 sm:$0xff]   ;;  %v5407_v59 = vld [vmem:[#allocation5 + $0x3ac] ss:$16 sps:$4 sm:$0xff]  }
  0xb9   :  { %1537 = vmatpush1.bf16.msra.mxu0 %v5316_v60  ;;  %1701 = vmatpush1.bf16.msra.mxu1 %v5317_v61  ;;  %v5402_v60 = vld [vmem:[#allocation5 + $0x3a0] ss:$16 sps:$4 sm:$0xff]   ;;  %v5405_v61 = vld [vmem:[#allocation5 + $0x3a8] ss:$16 sps:$4 sm:$0xff]  }
  0xba   :  { %1538 = vmatprep.subr.bf16.mxu0 %v5318_v62  ;;  %1702 = vmatprep.subr.bf16.mxu1 %v5320_v63  ;;  %v5410_v62 = vld [vmem:[#allocation5 + $0x3c4] ss:$16 sps:$4 sm:$0xff]   ;;  %v5413_v63 = vld [vmem:[#allocation5 + $0x3cc] ss:$16 sps:$4 sm:$0xff]  }
  0xbd   :  { %1539 = vmatpush1.bf16.msra.mxu0 %v5322_v0  ;;  %1703 = vmatpush1.bf16.msra.mxu1 %v5323_v1  ;;  %v5408_v0 = vld [vmem:[#allocation5 + $0x3c0] ss:$16 sps:$4 sm:$0xff]   ;;  %v5411_v1 = vld [vmem:[#allocation5 + $0x3c8] ss:$16 sps:$4 sm:$0xff]  }
  0xbe   :  { %1549 = vmatprep.subr.bf16.mxu0 %v5326_v3  ;;  %1713 = vmatprep.subr.bf16.mxu1 %v5329_v4  ;;  %v5419_v3 = vld [vmem:[#allocation5 + $0x3ec] ss:$16 sps:$4 sm:$0xff]   ;;  %v5414_v4 = vld [vmem:[#allocation5 + $0x3e0] ss:$16 sps:$4 sm:$0xff]  }
  0xc0   :  { %1541 = vmatmul.mubr.bf16.vlgmr.msra.gmra.mrb[0].mxu0 %v135_v5  ;;  %1705 = vmatmul.mubr.bf16.vlgmr.msra.gmra.mrb[0].mxu1 %v135_v5  ;;  %v5417_v5 = vld [vmem:[#allocation5 + $0x3e8] ss:$16 sps:$4 sm:$0xff]  }
  0xc1   :  { %1550 = vmatpush1.bf16.msra.mxu0 %v5324_v6  ;;  %1714 = vmatpush1.bf16.msra.mxu1 %v5327_v7  ;;  %v5422_v6 = vld [vmem:[#allocation5 + $0x404] ss:$16 sps:$4 sm:$0xff]   ;;  %v130_v7 = vld [vmem:[#allocation2 + $0x10] sm:$0xff] }
  0xc2   :  { %1551 = vmatprep.subr.bf16.mxu0 %v5332_v8  ;;  %1715 = vmatprep.subr.bf16.mxu1 %v5335_v9  ;;  %v5425_v8 = vld [vmem:[#allocation5 + $0x40c] ss:$16 sps:$4 sm:$0xff]   ;;  %v5420_v9 = vld [vmem:[#allocation5 + $0x400] ss:$16 sps:$4 sm:$0xff]  }
  0xc3   :  { %1581 = vmatprep.mubr.bf16.mxu0 %v138_v32  ;;  %1745 = vmatprep.mubr.bf16.mxu1 %v138_v32  ;;  %v5450_v32 = vld [vmem:[#allocation5 + $0x4a0] ss:$16 sps:$4 sm:$0xff]  }
  0xc5   :  { %1552 = vmatpush1.bf16.msra.mxu0 %v5330_v10  ;;  %1716 = vmatpush1.bf16.msra.mxu1 %v5333_v11  ;;  %v5423_v10 = vld [vmem:[#allocation5 + $0x408] ss:$16 sps:$4 sm:$0xff]   ;;  %v137_v11 = vpack.c.bf16 %v130_v7, %v130_v7  ;;  %v5515_v7 = vld [vmem:[#allocation5 + $0x5ec] ss:$16 sps:$4 sm:$0xff]  }
  0xc6   :  { %1553 = vmatprep.subr.bf16.mxu0 %v5338_v12  ;;  %1717 = vmatprep.subr.bf16.mxu1 %v5341_v13  ;;  %v5428_v12 = vld [vmem:[#allocation5 + $0x424] ss:$16 sps:$4 sm:$0xff]   ;;  %v5431_v13 = vld [vmem:[#allocation5 + $0x42c] ss:$16 sps:$4 sm:$0xff]  }
  0xc9   :  { %1554 = vmatpush1.bf16.msra.mxu0 %v5336_v14  ;;  %1718 = vmatpush1.bf16.msra.mxu1 %v5339_v15  ;;  %v133_v14 = vld [vmem:[#allocation2 + $0x28] sm:$0xff] }
  0xca   :  { %1555 = vmatprep.subr.bf16.mxu0 %v5344_v16  ;;  %1719 = vmatprep.subr.bf16.mxu1 %v5347_v17  ;;  %v140_v15 = vpack.c.bf16 %v133_v14, %v133_v14  ;;  %v5426_v16 = vld [vmem:[#allocation5 + $0x420] ss:$16 sps:$4 sm:$0xff]   ;;  %v5429_v17 = vld [vmem:[#allocation5 + $0x428] ss:$16 sps:$4 sm:$0xff]   ;;  %v5521_v14 = vld [vmem:[#allocation5 + $0x624] ss:$16 sps:$4 sm:$0xff]  }
  0xcd   :  { %1556 = vmatpush1.bf16.msra.mxu0 %v5342_v18  ;;  %1720 = vmatpush1.bf16.msra.mxu1 %v5345_v19  ;;  %v5434_v18 = vld [vmem:[#allocation5 + $0x444] ss:$16 sps:$4 sm:$0xff]   ;;  %v5437_v19 = vld [vmem:[#allocation5 + $0x44c] ss:$16 sps:$4 sm:$0xff]  }
  0xce   :  { %1557 = vmatprep.subr.bf16.mxu0 %v5350_v20  ;;  %1721 = vmatprep.subr.bf16.mxu1 %v5353_v21  ;;  %v5432_v20 = vld [vmem:[#allocation5 + $0x440] ss:$16 sps:$4 sm:$0xff]   ;;  %v5435_v21 = vld [vmem:[#allocation5 + $0x448] ss:$16 sps:$4 sm:$0xff]  }
  0xd1   :  { %1558 = vmatpush1.bf16.msra.mxu0 %v5348_v22  ;;  %1722 = vmatpush1.bf16.msra.mxu1 %v5351_v23  ;;  %v5440_v22 = vld [vmem:[#allocation5 + $0x464] ss:$16 sps:$4 sm:$0xff]   ;;  %v5443_v23 = vld [vmem:[#allocation5 + $0x46c] ss:$16 sps:$4 sm:$0xff]  }
  0xd2   :  { %1559 = vmatprep.subr.bf16.mxu0 %v5356_v24  ;;  %1723 = vmatprep.subr.bf16.mxu1 %v5359_v25  ;;  %v5438_v24 = vld [vmem:[#allocation5 + $0x460] ss:$16 sps:$4 sm:$0xff]   ;;  %v5441_v25 = vld [vmem:[#allocation5 + $0x468] ss:$16 sps:$4 sm:$0xff]  }
  0xd5   :  { %1560 = vmatpush1.bf16.msra.mxu0 %v5354_v26  ;;  %1724 = vmatpush1.bf16.msra.mxu1 %v5357_v27  ;;  %v5446_v26 = vld [vmem:[#allocation5 + $0x484] ss:$16 sps:$4 sm:$0xff]   ;;  %v5449_v27 = vld [vmem:[#allocation5 + $0x48c] ss:$16 sps:$4 sm:$0xff]  }
  0xd6   :  { %1561 = vmatprep.subr.bf16.mxu0 %v5362_v28  ;;  %1725 = vmatprep.subr.bf16.mxu1 %v5365_v29  ;;  %v5444_v28 = vld [vmem:[#allocation5 + $0x480] ss:$16 sps:$4 sm:$0xff]   ;;  %v5447_v29 = vld [vmem:[#allocation5 + $0x488] ss:$16 sps:$4 sm:$0xff]  }
  0xd9   :  { %1562 = vmatpush1.bf16.msra.mxu0 %v5360_v31  ;;  %1726 = vmatpush1.bf16.msra.mxu1 %v5363_v33  ;;  %v5455_v31 = vld [vmem:[#allocation5 + $0x4ac] ss:$16 sps:$4 sm:$0xff]   ;;  %v5453_v33 = vld [vmem:[#allocation5 + $0x4a8] ss:$16 sps:$4 sm:$0xff]  }
  0xda   :  { %1563 = vmatprep.subr.bf16.mxu0 %v5368_v34  ;;  %1727 = vmatprep.subr.bf16.mxu1 %v5371_v35  ;;  %v5458_v34 = vld [vmem:[#allocation5 + $0x4c4] ss:$16 sps:$4 sm:$0xff]   ;;  %v5461_v35 = vld [vmem:[#allocation5 + $0x4cc] ss:$16 sps:$4 sm:$0xff]  }
  0xdd   :  { %1564 = vmatpush1.bf16.msra.mxu0 %v5366_v36  ;;  %1728 = vmatpush1.bf16.msra.mxu1 %v5369_v37  ;;  %v5456_v36 = vld [vmem:[#allocation5 + $0x4c0] ss:$16 sps:$4 sm:$0xff]   ;;  %v5459_v37 = vld [vmem:[#allocation5 + $0x4c8] ss:$16 sps:$4 sm:$0xff]  }
  0xde   :  { %1565 = vmatprep.subr.bf16.mxu0 %v5374_v38  ;;  %1729 = vmatprep.subr.bf16.mxu1 %v5377_v39  ;;  %v5464_v38 = vld [vmem:[#allocation5 + $0x4e4] ss:$16 sps:$4 sm:$0xff]   ;;  %v5467_v39 = vld [vmem:[#allocation5 + $0x4ec] ss:$16 sps:$4 sm:$0xff]  }
  0xe1   :  { %1566 = vmatpush1.bf16.msra.mxu0 %v5372_v40  ;;  %1730 = vmatpush1.bf16.msra.mxu1 %v5375_v41  ;;  %v5462_v40 = vld [vmem:[#allocation5 + $0x4e0] ss:$16 sps:$4 sm:$0xff]   ;;  %v5465_v41 = vld [vmem:[#allocation5 + $0x4e8] ss:$16 sps:$4 sm:$0xff]  }
  0xe2   :  { %1567 = vmatprep.subr.bf16.mxu0 %v5380_v42  ;;  %1731 = vmatprep.subr.bf16.mxu1 %v5383_v43  ;;  %v5470_v42 = vld [vmem:[#allocation5 + $0x504] ss:$16 sps:$4 sm:$0xff]   ;;  %v5473_v43 = vld [vmem:[#allocation5 + $0x50c] ss:$16 sps:$4 sm:$0xff]  }
  0xe5   :  { %1568 = vmatpush1.bf16.msra.mxu0 %v5378_v44  ;;  %1732 = vmatpush1.bf16.msra.mxu1 %v5381_v45  ;;  %v5468_v44 = vld [vmem:[#allocation5 + $0x500] ss:$16 sps:$4 sm:$0xff]   ;;  %v5471_v45 = vld [vmem:[#allocation5 + $0x508] ss:$16 sps:$4 sm:$0xff]  }
  0xe6   :  { %1569 = vmatprep.subr.bf16.mxu0 %v5386_v46  ;;  %1733 = vmatprep.subr.bf16.mxu1 %v5389_v47  ;;  %v5476_v46 = vld [vmem:[#allocation5 + $0x524] ss:$16 sps:$4 sm:$0xff]   ;;  %v5479_v47 = vld [vmem:[#allocation5 + $0x52c] ss:$16 sps:$4 sm:$0xff]  }
  0xe9   :  { %1570 = vmatpush1.bf16.msra.mxu0 %v5384_v48  ;;  %1734 = vmatpush1.bf16.msra.mxu1 %v5387_v49  ;;  %v5474_v48 = vld [vmem:[#allocation5 + $0x520] ss:$16 sps:$4 sm:$0xff]   ;;  %v5477_v49 = vld [vmem:[#allocation5 + $0x528] ss:$16 sps:$4 sm:$0xff]  }
  0xea   :  { %1571 = vmatprep.subr.bf16.mxu0 %v5392_v50  ;;  %1735 = vmatprep.subr.bf16.mxu1 %v5395_v51  ;;  %v5482_v50 = vld [vmem:[#allocation5 + $0x544] ss:$16 sps:$4 sm:$0xff]   ;;  %v5485_v51 = vld [vmem:[#allocation5 + $0x54c] ss:$16 sps:$4 sm:$0xff]  }
  0xed   :  { %1572 = vmatpush1.bf16.msra.mxu0 %v5390_v52  ;;  %1736 = vmatpush1.bf16.msra.mxu1 %v5393_v53  ;;  %v5480_v52 = vld [vmem:[#allocation5 + $0x540] ss:$16 sps:$4 sm:$0xff]   ;;  %v5483_v53 = vld [vmem:[#allocation5 + $0x548] ss:$16 sps:$4 sm:$0xff]  }
  0xee   :  { %1573 = vmatprep.subr.bf16.mxu0 %v5398_v54  ;;  %1737 = vmatprep.subr.bf16.mxu1 %v5401_v55  ;;  %v5488_v54 = vld [vmem:[#allocation5 + $0x564] ss:$16 sps:$4 sm:$0xff]   ;;  %v5491_v55 = vld [vmem:[#allocation5 + $0x56c] ss:$16 sps:$4 sm:$0xff]  }
  0xf1   :  { %1574 = vmatpush1.bf16.msra.mxu0 %v5396_v56  ;;  %1738 = vmatpush1.bf16.msra.mxu1 %v5399_v57  ;;  %v5486_v56 = vld [vmem:[#allocation5 + $0x560] ss:$16 sps:$4 sm:$0xff]   ;;  %v5489_v57 = vld [vmem:[#allocation5 + $0x568] ss:$16 sps:$4 sm:$0xff]  }
  0xf2   :  { %1575 = vmatprep.subr.bf16.mxu0 %v5404_v58  ;;  %1739 = vmatprep.subr.bf16.mxu1 %v5407_v59  ;;  %v5494_v58 = vld [vmem:[#allocation5 + $0x584] ss:$16 sps:$4 sm:$0xff]   ;;  %v5497_v59 = vld [vmem:[#allocation5 + $0x58c] ss:$16 sps:$4 sm:$0xff]  }
  0xf5   :  { %1576 = vmatpush1.bf16.msra.mxu0 %v5402_v60  ;;  %1740 = vmatpush1.bf16.msra.mxu1 %v5405_v61  ;;  %v5492_v60 = vld [vmem:[#allocation5 + $0x580] ss:$16 sps:$4 sm:$0xff]   ;;  %v5495_v61 = vld [vmem:[#allocation5 + $0x588] ss:$16 sps:$4 sm:$0xff]  }
  0xf6   :  { %1577 = vmatprep.subr.bf16.mxu0 %v5410_v62  ;;  %1741 = vmatprep.subr.bf16.mxu1 %v5413_v63  ;;  %v5500_v62 = vld [vmem:[#allocation5 + $0x5a4] ss:$16 sps:$4 sm:$0xff]   ;;  %v5503_v63 = vld [vmem:[#allocation5 + $0x5ac] ss:$16 sps:$4 sm:$0xff]  }
  0xf9   :  { %1578 = vmatpush1.bf16.msra.mxu0 %v5408_v0  ;;  %1742 = vmatpush1.bf16.msra.mxu1 %v5411_v1  ;;  %v5498_v0 = vld [vmem:[#allocation5 + $0x5a0] ss:$16 sps:$4 sm:$0xff]   ;;  %v5501_v1 = vld [vmem:[#allocation5 + $0x5a8] ss:$16 sps:$4 sm:$0xff]  }
  0xfa   :  { %1579 = vmatprep.subr.bf16.mxu0 %v5416_v2  ;;  %1743 = vmatprep.subr.bf16.mxu1 %v5419_v3  ;;  %v5506_v2 = vld [vmem:[#allocation5 + $0x5c4] ss:$16 sps:$4 sm:$0xff]   ;;  %v5509_v3 = vld [vmem:[#allocation5 + $0x5cc] ss:$16 sps:$4 sm:$0xff]  }
  0xfd   :  { %1580 = vmatpush1.bf16.msra.mxu0 %v5414_v4  ;;  %1744 = vmatpush1.bf16.msra.mxu1 %v5417_v5  ;;  %v5504_v4 = vld [vmem:[#allocation5 + $0x5c0] ss:$16 sps:$4 sm:$0xff]   ;;  %v5507_v5 = vld [vmem:[#allocation5 + $0x5c8] ss:$16 sps:$4 sm:$0xff]  }
  0xfe   :  { %1590 = vmatprep.subr.bf16.mxu0 %v5422_v6  ;;  %1754 = vmatprep.subr.bf16.mxu1 %v5425_v8  ;;  %v5512_v6 = vld [vmem:[#allocation5 + $0x5e4] ss:$16 sps:$4 sm:$0xff]   ;;  %v5510_v8 = vld [vmem:[#allocation5 + $0x5e0] ss:$16 sps:$4 sm:$0xff]  }
 0x100   :  { %1582 = vmatmul.mubr.bf16.vlgmr.msra.gmra.mrb[0].mxu0 %v137_v11  ;;  %1746 = vmatmul.mubr.bf16.vlgmr.msra.gmra.mrb[0].mxu1 %v137_v11  ;;  %v5518_v11 = vld [vmem:[#allocation5 + $0x604] ss:$16 sps:$4 sm:$0xff]  }
 0x101   :  { %1591 = vmatpush1.bf16.msra.mxu0 %v5420_v9  ;;  %1755 = vmatpush1.bf16.msra.mxu1 %v5423_v10  ;;  %v5513_v9 = vld [vmem:[#allocation5 + $0x5e8] ss:$16 sps:$4 sm:$0xff]  }
 0x102   :  { %1592 = vmatprep.subr.bf16.mxu0 %v5428_v12  ;;  %1756 = vmatprep.subr.bf16.mxu1 %v5431_v13  ;;  %v132_v10 = vld [vmem:[#allocation2 + $0x20] sm:$0xff]  ;;  %v5516_v12 = vld [vmem:[#allocation5 + $0x600] ss:$16 sps:$4 sm:$0xff]  }
 0x103   :  { %1786 = vmatprep.mubr.bf16.mxu1 %v140_v15  ;;  %1622 = vmatprep.mubr.bf16.mxu0 %v140_v15  ;;  %v139_v13 = vpack.c.bf16 %v132_v10, %v132_v10  ;;  %v5519_v15 = vld [vmem:[#allocation5 + $0x620] ss:$16 sps:$4 sm:$0xff]   ;;  %v5591_v10 = vld [vmem:[#allocation7 + $0xa8] sm:$0xff]  }
 0x105   :  { %1593 = vmatpush1.bf16.msra.mxu0 %v5426_v16  ;;  %1757 = vmatpush1.bf16.msra.mxu1 %v5429_v17  ;;  %v5524_v16 = vld [vmem:[#allocation5 + $0x644] ss:$16 sps:$4 sm:$0xff]   ;;  %v6225_v17 = vmov 0  }
 0x106   :  { %1594 = vmatprep.subr.bf16.mxu0 %v5434_v18  ;;  %1758 = vmatprep.subr.bf16.mxu1 %v5437_v19  ;;  %v5522_v18 = vld [vmem:[#allocation5 + $0x640] ss:$16 sps:$4 sm:$0xff]   ;;  %v5527_v19 = vld [vmem:[#allocation5 + $0x664] ss:$16 sps:$4 sm:$0xff]  }
 0x109   :  { %1595 = vmatpush1.bf16.msra.mxu0 %v5432_v20  ;;  %1759 = vmatpush1.bf16.msra.mxu1 %v5435_v21  ;;  %v5525_v20 = vld [vmem:[#allocation5 + $0x660] ss:$16 sps:$4 sm:$0xff]   ;;  %v5530_v21 = vld [vmem:[#allocation5 + $0x684] ss:$16 sps:$4 sm:$0xff]  }
 0x10a   :  { %1596 = vmatprep.subr.bf16.mxu0 %v5440_v22  ;;  %1760 = vmatprep.subr.bf16.mxu1 %v5443_v23  ;;  %v5528_v22 = vld [vmem:[#allocation5 + $0x680] ss:$16 sps:$4 sm:$0xff]   ;;  %v5533_v23 = vld [vmem:[#allocation5 + $0x6a4] ss:$16 sps:$4 sm:$0xff]  }
 0x10d   :  { %1597 = vmatpush1.bf16.msra.mxu0 %v5438_v24  ;;  %1761 = vmatpush1.bf16.msra.mxu1 %v5441_v25  ;;  %v5531_v24 = vld [vmem:[#allocation5 + $0x6a0] ss:$16 sps:$4 sm:$0xff]   ;;  %v5536_v25 = vld [vmem:[#allocation5 + $0x6c4] ss:$16 sps:$4 sm:$0xff]  }
 0x10e   :  { %1598 = vmatprep.subr.bf16.mxu0 %v5446_v26  ;;  %1762 = vmatprep.subr.bf16.mxu1 %v5449_v27  ;;  %v5534_v26 = vld [vmem:[#allocation5 + $0x6c0] ss:$16 sps:$4 sm:$0xff]   ;;  %v5539_v27 = vld [vmem:[#allocation5 + $0x6e4] ss:$16 sps:$4 sm:$0xff]  }
 0x111   :  { %1599 = vmatpush1.bf16.msra.mxu0 %v5444_v28  ;;  %1763 = vmatpush1.bf16.msra.mxu1 %v5447_v29  ;;  %v5537_v28 = vld [vmem:[#allocation5 + $0x6e0] ss:$16 sps:$4 sm:$0xff]   ;;  %v134_v29 = vld [vmem:[#allocation2 + $0x30] sm:$0xff] }
 0x112   :  { %1600 = vmatprep.subr.bf16.mxu0 %v5452_v30  ;;  %1764 = vmatprep.subr.bf16.mxu1 %v5455_v31  ;;  %v5542_v30 = vld [vmem:[#allocation5 + $0x60c] ss:$16 sps:$4 sm:$0xff]   ;;  %v5540_v31 = vld [vmem:[#allocation5 + $0x608] ss:$16 sps:$4 sm:$0xff]  }
 0x115   :  { %1601 = vmatpush1.bf16.msra.mxu0 %v5450_v32  ;;  %1765 = vmatpush1.bf16.msra.mxu1 %v5453_v33  ;;  %v141_v32 = vpack.c.bf16 %v134_v29, %v134_v29  ;;  %v5545_v33 = vld [vmem:[#allocation5 + $0x62c] ss:$16 sps:$4 sm:$0xff]  }
 0x116   :  { %1602 = vmatprep.subr.bf16.mxu0 %v5458_v34  ;;  %1766 = vmatprep.subr.bf16.mxu1 %v5461_v35  ;;  %v5543_v34 = vld [vmem:[#allocation5 + $0x628] ss:$16 sps:$4 sm:$0xff]   ;;  %v5548_v35 = vld [vmem:[#allocation5 + $0x64c] ss:$16 sps:$4 sm:$0xff]  }
 0x119   :  { %1603 = vmatpush1.bf16.msra.mxu0 %v5456_v36  ;;  %1767 = vmatpush1.bf16.msra.mxu1 %v5459_v37  ;;  %v5546_v36 = vld [vmem:[#allocation5 + $0x648] ss:$16 sps:$4 sm:$0xff]   ;;  %v5551_v37 = vld [vmem:[#allocation5 + $0x66c] ss:$16 sps:$4 sm:$0xff]  }
 0x11a   :  { %1604 = vmatprep.subr.bf16.mxu0 %v5464_v38  ;;  %1768 = vmatprep.subr.bf16.mxu1 %v5467_v39  ;;  %v5549_v38 = vld [vmem:[#allocation5 + $0x668] ss:$16 sps:$4 sm:$0xff]   ;;  %v5554_v39 = vld [vmem:[#allocation5 + $0x68c] ss:$16 sps:$4 sm:$0xff]  }
 0x11d   :  { %1605 = vmatpush1.bf16.msra.mxu0 %v5462_v40  ;;  %1769 = vmatpush1.bf16.msra.mxu1 %v5465_v41  ;;  %v5552_v40 = vld [vmem:[#allocation5 + $0x688] ss:$16 sps:$4 sm:$0xff]   ;;  %v5557_v41 = vld [vmem:[#allocation5 + $0x6ac] ss:$16 sps:$4 sm:$0xff]  }
 0x11e   :  { %1606 = vmatprep.subr.bf16.mxu0 %v5470_v42  ;;  %1770 = vmatprep.subr.bf16.mxu1 %v5473_v43  ;;  %v5555_v42 = vld [vmem:[#allocation5 + $0x6a8] ss:$16 sps:$4 sm:$0xff]   ;;  %v5560_v43 = vld [vmem:[#allocation5 + $0x6cc] ss:$16 sps:$4 sm:$0xff]  }
 0x121   :  { %1607 = vmatpush1.bf16.msra.mxu0 %v5468_v44  ;;  %1771 = vmatpush1.bf16.msra.mxu1 %v5471_v45  ;;  %v5558_v44 = vld [vmem:[#allocation5 + $0x6c8] ss:$16 sps:$4 sm:$0xff]   ;;  %v5563_v45 = vld [vmem:[#allocation5 + $0x6ec] ss:$16 sps:$4 sm:$0xff]  }
 0x122   :  { %1608 = vmatprep.subr.bf16.mxu0 %v5476_v46  ;;  %1772 = vmatprep.subr.bf16.mxu1 %v5479_v47  ;;  %v5561_v46 = vld [vmem:[#allocation5 + $0x6e8] ss:$16 sps:$4 sm:$0xff]   ;;  %v5564_v47 = vld [vmem:[#allocation7 + $0x40] sm:$0xff]  }
 0x125   :  { %1609 = vmatpush1.bf16.msra.mxu0 %v5474_v48  ;;  %1773 = vmatpush1.bf16.msra.mxu1 %v5477_v49  ;;  %v5565_v48 = vld [vmem:[#allocation7] sm:$0xff]   ;;  %v5566_v49 = vld [vmem:[#allocation7 + $0x48] sm:$0xff]  }
 0x126   :  { %1610 = vmatprep.subr.bf16.mxu0 %v5482_v50  ;;  %1774 = vmatprep.subr.bf16.mxu1 %v5485_v51  ;;  %v5567_v50 = vld [vmem:[#allocation7 + $0x8] sm:$0xff]   ;;  %v5568_v51 = vld [vmem:[#allocation7 + $0x50] sm:$0xff]  }
 0x129   :  { %1611 = vmatpush1.bf16.msra.mxu0 %v5480_v52  ;;  %1775 = vmatpush1.bf16.msra.mxu1 %v5483_v53  ;;  %v5569_v52 = vld [vmem:[#allocation7 + $0x10] sm:$0xff]   ;;  %v5570_v53 = vld [vmem:[#allocation7 + $0x58] sm:$0xff]  }
 0x12a   :  { %1612 = vmatprep.subr.bf16.mxu0 %v5488_v54  ;;  %1776 = vmatprep.subr.bf16.mxu1 %v5491_v55  ;;  %v5571_v54 = vld [vmem:[#allocation7 + $0x18] sm:$0xff]   ;;  %v5572_v55 = vld [vmem:[#allocation7 + $0x60] sm:$0xff]  }
 0x12d   :  { %1613 = vmatpush1.bf16.msra.mxu0 %v5486_v56  ;;  %1777 = vmatpush1.bf16.msra.mxu1 %v5489_v57  ;;  %v5573_v56 = vld [vmem:[#allocation7 + $0x20] sm:$0xff]   ;;  %v5574_v57 = vld [vmem:[#allocation7 + $0x68] sm:$0xff]  }
 0x12e   :  { %1614 = vmatprep.subr.bf16.mxu0 %v5494_v58  ;;  %1778 = vmatprep.subr.bf16.mxu1 %v5497_v59  ;;  %v5575_v58 = vld [vmem:[#allocation7 + $0x28] sm:$0xff]   ;;  %v5576_v59 = vld [vmem:[#allocation7 + $0x70] sm:$0xff]  }
 0x131   :  { %1615 = vmatpush1.bf16.msra.mxu0 %v5492_v60  ;;  %1779 = vmatpush1.bf16.msra.mxu1 %v5495_v61  ;;  %v5577_v60 = vld [vmem:[#allocation7 + $0x30] sm:$0xff]   ;;  %v5578_v61 = vld [vmem:[#allocation7 + $0x78] sm:$0xff]  }
 0x132   :  { %1616 = vmatprep.subr.bf16.mxu0 %v5500_v62  ;;  %1780 = vmatprep.subr.bf16.mxu1 %v5503_v63  ;;  %v5579_v62 = vld [vmem:[#allocation7 + $0x38] sm:$0xff]   ;;  %v5580_v63 = vld [vmem:[#allocation7 + $0xc0] sm:$0xff]  }
 0x135   :  { %1617 = vmatpush1.bf16.msra.mxu0 %v5498_v0  ;;  %1781 = vmatpush1.bf16.msra.mxu1 %v5501_v1  ;;  %v5581_v0 = vld [vmem:[#allocation7 + $0x80] sm:$0xff]   ;;  %v5582_v1 = vld [vmem:[#allocation7 + $0xc8] sm:$0xff]  }
 0x136   :  { %1618 = vmatprep.subr.bf16.mxu0 %v5506_v2  ;;  %1782 = vmatprep.subr.bf16.mxu1 %v5509_v3  ;;  %v5583_v2 = vld [vmem:[#allocation7 + $0x88] sm:$0xff]   ;;  %v5584_v3 = vld [vmem:[#allocation7 + $0xd0] sm:$0xff]  }
 0x139   :  { %1619 = vmatpush1.bf16.msra.mxu0 %v5504_v4  ;;  %1783 = vmatpush1.bf16.msra.mxu1 %v5507_v5  ;;  %v5585_v4 = vld [vmem:[#allocation7 + $0x90] sm:$0xff]   ;;  %v5586_v5 = vld [vmem:[#allocation7 + $0xd8] sm:$0xff]  }
 0x13a   :  { %1620 = vmatprep.subr.bf16.mxu0 %v5512_v6  ;;  %1784 = vmatprep.subr.bf16.mxu1 %v5515_v7  ;;  %v5587_v6 = vld [vmem:[#allocation7 + $0x98] sm:$0xff]   ;;  %v5588_v7 = vld [vmem:[#allocation7 + $0xe0] sm:$0xff]  }
 0x13d   :  { %1621 = vmatpush1.bf16.msra.mxu0 %v5510_v8  ;;  %1785 = vmatpush1.bf16.msra.mxu1 %v5513_v9  ;;  %v5589_v8 = vld [vmem:[#allocation7 + $0xa0] sm:$0xff]   ;;  %v5590_v9 = vld [vmem:[#allocation7 + $0xe8] sm:$0xff]  }
 0x13e   :  { %1631 = vmatprep.subr.bf16.mxu0 %v5518_v11  ;;  %5062 = vmatprep.subr.bf16.mxu1 %v5580_v63  ;;  %v5592_v11 = vld [vmem:[#allocation7 + $0xf0] sm:$0xff]  }
 0x140   :  { %1787 = vmatmul.mubr.bf16.vlgmr.msra.gmra.mrb[0].mxu1 %v139_v13  ;;  %1623 = vmatmul.mubr.bf16.vlgmr.msra.gmra.mrb[0].mxu0 %v139_v13  ;;  %v5594_v13 = vld [vmem:[#allocation7 + $0xf8] sm:$0xff]  }
 0x141   :  { %1632 = vmatpush1.bf16.msra.mxu0 %v5516_v12  ;;  %1663 = vmatprep.mubr.bf16.mxu0 %v6225_v17  ;;  %v5593_v12 = vld [vmem:[#allocation7 + $0xb0] sm:$0xff]  }
 0x142   :  { %1633 = vmatprep.subr.bf16.mxu0 %v5521_v14  ;;  %5063 = vmatpush3.bf16.msra.mxu1 %v5581_v0  ;;  %v5595_v14 = vld [vmem:[#allocation7 + $0xb8] sm:$0xff]  }
 0x143   :  { %5064 = vmatprep.subr.bf16.mxu1 %v5582_v1 }
 0x145   :  { %1634 = vmatpush1.bf16.msra.mxu0 %v5519_v15 }
 0x146   :  { %1635 = vmatprep.subr.bf16.mxu0 %v5524_v16  ;;  %5065 = vmatpush3.bf16.msra.mxu1 %v5583_v2 }
 0x147   :  { %5066 = vmatprep.subr.bf16.mxu1 %v5584_v3  ;;  %v1908_v3 = vld [vmem:[#allocation13 + $0x1] ss:$0 sm:$0xff] }
 0x149   :  { %1636 = vmatpush1.bf16.msra.mxu0 %v5522_v18 }
 0x14a   :  { %1637 = vmatprep.subr.bf16.mxu0 %v5527_v19  ;;  %5067 = vmatpush3.bf16.msra.mxu1 %v5585_v4 }
 0x14b   :  { %5068 = vmatprep.subr.bf16.mxu1 %v5586_v5 }
 0x14d   :  { %1638 = vmatpush1.bf16.msra.mxu0 %v5525_v20  ;;  %v368_v20 = vlaneseq }
 0x14e   :  { %1639 = vmatprep.subr.bf16.mxu0 %v5530_v21  ;;  %5069 = vmatpush3.bf16.msra.mxu1 %v5587_v6 }
 0x14f   :  { %5070 = vmatprep.subr.bf16.mxu1 %v5588_v7  ;;  %v6384_v21 = vshrl.u32 %v368_v20, 7 }
 0x151   :  { %1640 = vmatpush1.bf16.msra.mxu0 %v5528_v22  ;;  %v6387_v22 = vsub.s32 0, %v6384_v21 }
 0x152   :  { %1641 = vmatprep.subr.bf16.mxu0 %v5533_v23  ;;  %5071 = vmatpush3.bf16.msra.mxu1 %v5589_v8  ;;  %v6390_v23 = vsub.s32 1, %v6384_v21 }
 0x153   :  { %5072 = vmatprep.subr.bf16.mxu1 %v5590_v9 }
 0x155   :  { %1642 = vmatpush1.bf16.msra.mxu0 %v5531_v24  ;;  %v366_v24 = vld [vmem:[#allocation13] ss:$8 sm:$0xf] }
 0x156   :  { %1643 = vmatprep.subr.bf16.mxu0 %v5536_v25  ;;  %5073 = vmatpush3.bf16.msra.mxu1 %v5591_v10  ;;  %v371_v25 = vrot.slane %v366_v24, %v6387_v22 }
 0x157   :  { %5074 = vmatprep.subr.bf16.mxu1 %v5592_v11 }
 0x159   :  { %1644 = vmatpush1.bf16.msra.mxu0 %v5534_v26  ;;  %v375_v26 = vrot.slane %v366_v24, %v6390_v23 }
 0x15a   :  { %1645 = vmatprep.subr.bf16.mxu0 %v5539_v27  ;;  %5075 = vmatpush3.bf16.msra.mxu1 %v5593_v12 }
 0x15b   :  { %5076 = vmatprep.subr.bf16.mxu1 %v5594_v13  ;;  %v2299_v13 = vld [vmem:[%s6492_s5] sm:$0x1]  ;;  %s6228_s5 = smov 126  }
 0x15d   :  { %1646 = vmatpush1.bf16.msra.mxu0 %v5537_v28 }
 0x15e   :  { %1795 = vmatprep.subr.bf16.mxu0 %v5542_v30  ;;  %5077 = vmatpush3.bf16.msra.mxu1 %v5595_v14  ;;  %v2307_v14 = vsel %vm2305_vm1, %v2299_v13, 0 }
 0x160   :  { %1664 = vmatmul.mubr.bf16.vlgmr.msra.gmra.mrb[0].mxu0 %v141_v32 }
 0x161   :  { %1796 = vmatpush1.bf16.msra.mxu0 %v5540_v31  ;;  %1827 = vmatprep.mubr.bf16.mxu0 %v6225_v17 }
 0x162   :  { %1797 = vmatprep.subr.bf16.mxu0 %v5545_v33 }
 0x165   :  { %1798 = vmatpush1.bf16.msra.mxu0 %v5543_v34 }
 0x166   :  { %1799 = vmatprep.subr.bf16.mxu0 %v5548_v35 }
 0x169   :  { %1800 = vmatpush1.bf16.msra.mxu0 %v5546_v36 }
 0x16a   :  { %1801 = vmatprep.subr.bf16.mxu0 %v5551_v37  ;;  %v6395_v37 = vsub.s32 2, %v6384_v21 }
 0x16d   :  { %1802 = vmatpush1.bf16.msra.mxu0 %v5549_v38  ;;  %v6398_v38 = vsub.s32 3, %v6384_v21 }
 0x16e   :  { %1803 = vmatprep.subr.bf16.mxu0 %v5554_v39  ;;  %v379_v39 = vrot.slane %v366_v24, %v6395_v37 }
 0x171   :  { %1804 = vmatpush1.bf16.msra.mxu0 %v5552_v40  ;;  %v383_v40 = vrot.slane %v366_v24, %v6398_v38 }
 0x172   :  { %1805 = vmatprep.subr.bf16.mxu0 %v5557_v41 }
 0x175   :  { %1806 = vmatpush1.bf16.msra.mxu0 %v5555_v42 }
 0x176   :  { %1807 = vmatprep.subr.bf16.mxu0 %v5560_v43 }
 0x179   :  { %1808 = vmatpush1.bf16.msra.mxu0 %v5558_v44 }
 0x17a   :  { %1809 = vmatprep.subr.bf16.mxu0 %v5563_v45 }
 0x17d   :  { %1810 = vmatpush1.bf16.msra.mxu0 %v5561_v46 }
 0x17e   :  { %5040 = vmatprep.subr.bf16.mxu0 %v5564_v47 }
 0x180   :  { %1828 = vmatmul.mubr.bf16.vlgmr.msra.gmra.mrb[4].mxu0 %v141_v32 }
 0x181   :  { %5041 = vmatpush3.bf16.msra.mxu0 %v5565_v48 }
 0x182   :  { %5042 = vmatprep.subr.bf16.mxu0 %v5566_v49 }
 0x185   :  { %5043 = vmatpush3.bf16.msra.mxu0 %v5567_v50 }
 0x186   :  { %5044 = vmatprep.subr.bf16.mxu0 %v5568_v51 }
 0x189   :  { %5045 = vmatpush3.bf16.msra.mxu0 %v5569_v52 }
 0x18a   :  { %5046 = vmatprep.subr.bf16.mxu0 %v5570_v53  ;;  %v5596_v53 = vld [vmem:[#allocation8] sm:$0xff]  }
 0x18d   :  { %5047 = vmatpush3.bf16.msra.mxu0 %v5571_v54  ;;  %v6226_v54 = vmov 0.0  }
 0x18e   :  { %5048 = vmatprep.subr.bf16.mxu0 %v5572_v55  ;;  %5159 = vmatprep.subr.bf16.mxu1 %v6226_v54  ;;  %v5597_v55 = vld [vmem:[#allocation8 + $0x8] sm:$0xff]  }
 0x191   :  { %5049 = vmatpush3.bf16.msra.mxu0 %v5573_v56  ;;  %v5598_v56 = vld [vmem:[#allocation8 + $0x10] sm:$0xff]  }
 0x192   :  { %5050 = vmatprep.subr.bf16.mxu0 %v5574_v57  ;;  %v5599_v57 = vld [vmem:[#allocation8 + $0x18] sm:$0xff]  }
 0x195   :  { %5051 = vmatpush3.bf16.msra.mxu0 %v5575_v58  ;;  %v5600_v58 = vld [vmem:[#allocation8 + $0x20] sm:$0xff]  }
 0x196   :  { %5052 = vmatprep.subr.bf16.mxu0 %v5576_v59  ;;  %v5601_v59 = vld [vmem:[#allocation8 + $0x28] sm:$0xff]  }
 0x199   :  { %5053 = vmatpush3.bf16.msra.mxu0 %v5577_v60  ;;  %v5602_v60 = vld [vmem:[#allocation8 + $0x30] sm:$0xff]  }
 0x19a   :  { %5054 = vmatprep.subr.bf16.mxu0 %v5578_v61  ;;  %v5603_v61 = vld [vmem:[#allocation8 + $0x38] sm:$0xff]  }
 0x19d   :  { %5055 = vmatpush3.bf16.msra.mxu0 %v5579_v62 }
 0x19e   :  { %5139 = vmatprep.subr.bf16.mxu0 %v6226_v54 }
 0x213   :  { %v1788_v15 = vpop.f32.mrb[0].mxu1 }
 0x214   :  { %v1790_v16 = vpop.f32.mrb[1].mxu1  ;;  %v5167_v41 = vadd.f32 %v1788_v15, %v379_v39  ;;  %v2199_v15 = vld [vmem:[#allocation13 + $0x2] ss:$0 sm:$0xff]  ;;  %v5633_v39 = vld [vmem:[#allocation10 + $0x8c] ss:$16 sps:$4 sm:$0xff]  }
 0x215   :  { %v1792_v18 = vpop.f32.mrb[2].mxu1  ;;  %v5169_v42 = vadd.f32 %v1790_v16, %v383_v40  ;;  %v5631_v40 = vld [vmem:[#allocation10 + $0x88] ss:$16 sps:$4 sm:$0xff]  }
 0x216   :  { %v1793_v19 = vpop.f32.mrb[3].mxu1 }
 0x233   :  { %v1665_v27 = vpop.f32.mrb[0].mxu0 }
 0x234   :  { %v5165_v28 = vadd.f32 %v1665_v27, %v371_v25  ;;  %v1667_v29 = vpop.f32.mrb[1].mxu0  ;;  %v5606_v27 = vld [vmem:[#allocation10 + $0x4] ss:$16 sps:$4 sm:$0xff]  }
 0x235   :  { %v5166_v30 = vadd.f32 %v1667_v29, %v375_v26  ;;  %v1669_v31 = vpop.f32.mrb[2].mxu0  ;;  %v5609_v29 = vld [vmem:[#allocation10 + $0xc] ss:$16 sps:$4 sm:$0xff]  }
 0x236   :  { %v1836_v32 = vmax.f32 %v5165_v28, 0.0  ;;  %v1670_v33 = vpop.f32.mrb[3].mxu0  ;;  %v5607_v28 = vld [vmem:[#allocation10 + $0x8] ss:$16 sps:$4 sm:$0xff]  }
 0x237   :  { %v1837_v34 = vmax.f32 %v5166_v30, 0.0  ;;  %v5615_v30 = vld [vmem:[#allocation10 + $0x2c] ss:$16 sps:$4 sm:$0xff]   ;;  %v5613_v31 = vld [vmem:[#allocation10 + $0x28] ss:$16 sps:$4 sm:$0xff]  }
 0x238   :  { %v1840_v36 = vpack.c.bf16 %v1836_v32, %v1836_v32  ;;  %v5621_v33 = vld [vmem:[#allocation10 + $0x4c] ss:$16 sps:$4 sm:$0xff]  }
 0x239   :  { %v1841_v35 = vpack.c.bf16 %v1837_v34, %v1837_v34  ;;  %v5619_v34 = vld [vmem:[#allocation10 + $0x48] ss:$16 sps:$4 sm:$0xff]  }
 0x23b   :  { %2133 = vmatprep.mubr.bf16.mxu0 %v1841_v35  ;;  %v5627_v35 = vld [vmem:[#allocation10 + $0x6c] ss:$16 sps:$4 sm:$0xff]  }
 0x23c   :  { %2134 = vmatmul.mubr.bf16.vlgmr.msra.gmra.mrb[8].mxu0 %v1840_v36  ;;  %v5625_v36 = vld [vmem:[#allocation10 + $0x68] ss:$16 sps:$4 sm:$0xff]  }
 0x23d   :  { %5140 = vmatpush3.bf16.msra.mxu0 %v5596_v53  ;;  %5155 = vmatprep.mubr.msk.bf16.mxu0 %vm6227_vm0, %v6226_v54  ;;  %v5618_v53 = vld [vmem:[#allocation10 + $0x44] ss:$16 sps:$4 sm:$0xff]  }
 0x23e   :  { %5141 = vmatprep.subr.bf16.mxu0 %v6226_v54 }
 0x241   :  { %5142 = vmatpush3.bf16.msra.mxu0 %v5597_v55  ;;  %v5624_v55 = vld [vmem:[#allocation10 + $0x64] ss:$16 sps:$4 sm:$0xff]  }
 0x242   :  { %5143 = vmatprep.subr.bf16.mxu0 %v6226_v54 }
 0x245   :  { %5144 = vmatpush3.bf16.msra.mxu0 %v5598_v56  ;;  %v5622_v56 = vld [vmem:[#allocation10 + $0x60] ss:$16 sps:$4 sm:$0xff]  }
 0x246   :  { %5145 = vmatprep.subr.bf16.mxu0 %v6226_v54 }
 0x249   :  { %5146 = vmatpush3.bf16.msra.mxu0 %v5599_v57  ;;  %v5630_v57 = vld [vmem:[#allocation10 + $0x84] ss:$16 sps:$4 sm:$0xff]  }
 0x24a   :  { %5147 = vmatprep.subr.bf16.mxu0 %v6226_v54 }
 0x24d   :  { %5148 = vmatpush3.bf16.msra.mxu0 %v5600_v58  ;;  %v5628_v58 = vld [vmem:[#allocation10 + $0x80] ss:$16 sps:$4 sm:$0xff]  }
 0x24e   :  { %5149 = vmatprep.subr.bf16.mxu0 %v6226_v54 }
 0x251   :  { %5150 = vmatpush3.bf16.msra.mxu0 %v5601_v59  ;;  %v5636_v59 = vld [vmem:[#allocation10 + $0xa4] ss:$16 sps:$4 sm:$0xff]  }
 0x252   :  { %5151 = vmatprep.subr.bf16.mxu0 %v6226_v54 }
 0x253   :  { %v1829_v43 = vpop.f32.mrb[4].mxu0 }
 0x254   :  { %v5168_v44 = vadd.f32 %v5167_v41, %v1829_v43  ;;  %v1831_v45 = vpop.f32.mrb[5].mxu0  ;;  %v5639_v41 = vld [vmem:[#allocation10 + $0xac] ss:$16 sps:$4 sm:$0xff]  }
 0x255   :  { %v5170_v46 = vadd.f32 %v5169_v42, %v1831_v45  ;;  %v1833_v47 = vpop.f32.mrb[6].mxu0  ;;  %5152 = vmatpush3.bf16.msra.mxu0 %v5602_v60  ;;  %v5637_v42 = vld [vmem:[#allocation10 + $0xa8] ss:$16 sps:$4 sm:$0xff]   ;;  %v5645_v43 = vld [vmem:[#allocation10 + $0xcc] ss:$16 sps:$4 sm:$0xff]  }
 0x256   :  { %v1838_v48 = vmax.f32 %v5168_v44, 0.0  ;;  %v1834_v49 = vpop.f32.mrb[7].mxu0  ;;  %5153 = vmatprep.subr.bf16.mxu0 %v6226_v54  ;;  %v5643_v44 = vld [vmem:[#allocation10 + $0xc8] ss:$16 sps:$4 sm:$0xff]   ;;  %v5634_v60 = vld [vmem:[#allocation10 + $0xa0] ss:$16 sps:$4 sm:$0xff]  }
 0x257   :  { %v1839_v50 = vmax.f32 %v5170_v46, 0.0  ;;  %v2288_v45 = vld [vmem:[%s6488_s1] sm:$0xff]  ;;  %v5604_v49 = vld [vmem:[#allocation10] ss:$16 sps:$4 sm:$0xff]   ;;  %s6229_s1 = smov [#allocation15]  }
 0x258   :  { %v1842_v52 = vpack.c.bf16 %v1838_v48, %v1838_v48  ;;  %s4496_s25 = sshll.u32 %s6229_s1, 4  ;;  %s4497_s25 = int_to_ptr.vmem [resolvable:$true] %s4496_s25 }
 0x259   :  { %v1843_v51 = vpack.c.bf16 %v1839_v50, %v1839_v50  ;;  %5154 = vmatpush3.bf16.msra.mxu0 %v5603_v61  ;;  %v5642_v61 = vld [vmem:[#allocation10 + $0xc4] ss:$16 sps:$4 sm:$0xff]   ;;  %s6156_s26 = scalar_lea.vmem %s4497_s25, 128  ;;  %p6161_p1 = scmp.lt.s32.totalorder %s4497_s25, %s4497_s25 }
 0x25a   :  { %2607 = vmatprep.subr.bf16.mxu0 %v5609_v29  ;;  %v5673_v29 = vld [vmem:[#allocation11 + $0xb0] ss:$28 sps:$4 sm:$0xff]   ;;  %p6157_p0 = scmp.ne.s32.totalorder %s4497_s25, %s6156_s26  ;;  %p6162_p2 = scmp.lt.s32.totalorder %s6156_s26, %s6156_s26 }
 0x25b   :  { %2173 = vmatprep.mubr.bf16.mxu1 %v1843_v51  ;;  %v5612_v51 = vld [vmem:[#allocation10 + $0x24] ss:$16 sps:$4 sm:$0xff]  }
 0x25c   :  { %2174 = vmatmul.mubr.bf16.vlgmr.msra.gmra.mrb[4].mxu1 %v1842_v52  ;;  %v5610_v52 = vld [vmem:[#allocation10 + $0x20] ss:$16 sps:$4 sm:$0xff]   ;;  %p6163_p3 = por %p6162_p2, %p6161_p1 }
 0x25d   :  { %5161 = vmatprep.mubr.msk.bf16.mxu1 %vm6227_vm0, %v6226_v54  ;;  %5160 = vmatpush3.bf16.msra.mxu1 %v2307_v14  ;;  %v5616_v54 = vld [vmem:[#allocation10 + $0x40] ss:$16 sps:$4 sm:$0xff]   ;;  %v5660_v14 = vld [vmem:[#allocation11 + $0x3c] ss:$28 sps:$4 sm:$0xff]  }
 0x25e   :  { %2566 = vmatprep.subr.bf16.mxu1 %v5606_v27  ;;  %v5675_v27 = vld [vmem:[#allocation11 + $0xb4] ss:$28 sps:$4 sm:$0xff]   ;;  %p6164_p4 = pnand %p6163_p3, %p6157_p0 }
 0x30f   :  { %v5056_v62 = vpop.f32.mrb[8].mxu0 }
 0x310   :  { %v5057_v63 = vpop.f32.mrb[9].mxu0 }
 0x311   :  { %v5058_v0 = vadd.f32 %v5057_v63, %v5056_v62  ;;  %v5059_v1 = vpop.f32.mrb[10].mxu0  ;;  %v5648_v62 = vld [vmem:[#allocation10 + $0xe4] ss:$16 sps:$4 sm:$0xff]   ;;  %v5651_v63 = vld [vmem:[#allocation10 + $0xec] ss:$16 sps:$4 sm:$0xff]  }
 0x312   :  { %v5060_v2 = vpop.f32.mrb[11].mxu0  ;;  %v5649_v1 = vld [vmem:[#allocation10 + $0xe8] ss:$16 sps:$4 sm:$0xff]  }
 0x313   :  { %v2136_v6 = vadd.f32 %v5058_v0, %v1908_v3  ;;  %v5646_v0 = vld [vmem:[#allocation10 + $0xe0] ss:$16 sps:$4 sm:$0xff]   ;;  %v5657_v3 = vld [vmem:[#allocation11 + $0xc] ss:$28 sps:$4 sm:$0xff]  }
 0x314   :  { %v5654_v2 = vld [vmem:[#allocation11 + $0x4] ss:$28 sps:$4 sm:$0xff]  }
 0x32f   :  { %v5078_v4 = vpop.f32.mrb[4].mxu1 }
 0x330   :  { %v5079_v5 = vpop.f32.mrb[5].mxu1 }
 0x331   :  { %v5080_v7 = vadd.f32 %v5079_v5, %v5078_v4  ;;  %v5081_v8 = vpop.f32.mrb[6].mxu1  ;;  %v2300_v4 = vld [vmem:[#allocation13 + $0x3] ss:$0 sm:$0xff] }
 0x332   :  { %v5082_v9 = vpop.f32.mrb[7].mxu1 }
 0x333   :  { %v2176_v10 = vadd.f32 %v5080_v7, %v2136_v6 }
 0x335   :  { %v2181_v11 = vmax.f32 %v2176_v10, 0.0 }
 0x337   :  { %v2182_v12 = vpack.c.bf16 %v2181_v11, %v2181_v11  ;;  %v5652_v11 = vld [vmem:[#allocation11] ss:$28 sps:$4 sm:$0xff]  }
 0x339   :  { %5156 = vmatmul.mubr.bf16.vlgmr.msra.gmra.mrb[12].mxu0 %v2182_v12  ;;  %v5655_v12 = vld [vmem:[#allocation11 + $0x8] ss:$28 sps:$4 sm:$0xff]  }
 0x33a   :  { %2639 = vmatprep.mubr.bf16.mxu0 %v6225_v17  ;;  %2608 = vmatpush1.bf16.msra.mxu0 %v5607_v28  ;;  %v5670_v28 = vld [vmem:[#allocation11 + $0xa8] ss:$28 sps:$4 sm:$0xff]  }
 0x33b   :  { %2609 = vmatprep.subr.bf16.mxu0 %v5615_v30  ;;  %v5678_v30 = vld [vmem:[#allocation11 + $0xe4] ss:$28 sps:$4 sm:$0xff]  }
 0x33e   :  { %2610 = vmatpush1.bf16.msra.mxu0 %v5613_v31  ;;  %v5681_v31 = vld [vmem:[#allocation11 + $0xec] ss:$28 sps:$4 sm:$0xff]  }
 0x33f   :  { %2611 = vmatprep.subr.bf16.mxu0 %v5621_v33  ;;  %v5679_v33 = vld [vmem:[#allocation11 + $0xe8] ss:$28 sps:$4 sm:$0xff]  }
 0x342   :  { %2612 = vmatpush1.bf16.msra.mxu0 %v5619_v34  ;;  %v5684_v34 = vld [vmem:[#allocation11 + $0x11c] ss:$28 sps:$4 sm:$0xff]  }
 0x343   :  { %2613 = vmatprep.subr.bf16.mxu0 %v5627_v35  ;;  %v5687_v35 = vld [vmem:[#allocation11 + $0x124] ss:$28 sps:$4 sm:$0xff]  }
 0x346   :  { %2614 = vmatpush1.bf16.msra.mxu0 %v5625_v36  ;;  %v5682_v36 = vld [vmem:[#allocation11 + $0x118] ss:$28 sps:$4 sm:$0xff]  }
 0x347   :  { %2615 = vmatprep.subr.bf16.mxu0 %v5633_v39  ;;  %v5685_v39 = vld [vmem:[#allocation11 + $0x120] ss:$28 sps:$4 sm:$0xff]  }
 0x34a   :  { %2616 = vmatpush1.bf16.msra.mxu0 %v5631_v40  ;;  %v5690_v40 = vld [vmem:[#allocation11 + $0x154] ss:$28 sps:$4 sm:$0xff]  }
 0x34b   :  { %2617 = vmatprep.subr.bf16.mxu0 %v5639_v41  ;;  %v5693_v41 = vld [vmem:[#allocation11 + $0x15c] ss:$28 sps:$4 sm:$0xff]  }
 0x34e   :  { %2618 = vmatpush1.bf16.msra.mxu0 %v5637_v42  ;;  %v5688_v42 = vld [vmem:[#allocation11 + $0x150] ss:$28 sps:$4 sm:$0xff]  }
 0x34f   :  { %2619 = vmatprep.subr.bf16.mxu0 %v5645_v43  ;;  %v5691_v43 = vld [vmem:[#allocation11 + $0x158] ss:$28 sps:$4 sm:$0xff]  }
 0x352   :  { %2620 = vmatpush1.bf16.msra.mxu0 %v5643_v44  ;;  %v5696_v44 = vld [vmem:[#allocation11 + $0x18c] ss:$28 sps:$4 sm:$0xff]  }
 0x353   :  { %2621 = vmatprep.subr.bf16.mxu0 %v5651_v63  ;;  %v5726_v63 = vld [vmem:[#allocation11 + $0x2a4] ss:$28 sps:$4 sm:$0xff]  }
 0x356   :  { %2622 = vmatpush1.bf16.msra.mxu0 %v5649_v1  ;;  %v5724_v1 = vld [vmem:[#allocation11 + $0x2a0] ss:$28 sps:$4 sm:$0xff]  }
 0x357   :  { %4186 = vmatprep.subr.bf16.mxu0 %v5657_v3  ;;  %v5732_v3 = vld [vmem:[#allocation11 + $0x2dc] ss:$28 sps:$4 sm:$0xff]  }
 0x40c   :  { %v2282_v16 = vpop.f32.mrb[12].mxu0 }
 0x40d   :  { %v2283_v18 = vadd.f32 %v2282_v16, %v2199_v15  ;;  %v5157_v19 = vpop.f32.mrb[13].mxu0  ;;  %v5663_v15 = vld [vmem:[#allocation11 + $0x44] ss:$28 sps:$4 sm:$0xff]   ;;  %v5658_v16 = vld [vmem:[#allocation11 + $0x38] ss:$28 sps:$4 sm:$0xff]  }
 0x40e   :  { %v2285_v20 = vpop.f32.mrb[14].mxu0  ;;  %v5666_v19 = vld [vmem:[#allocation11 + $0x74] ss:$28 sps:$4 sm:$0xff]  }
 0x40f   :  { %v2289_v24 = vmul.f32 0.5, %v2283_v18  ;;  %4479 = vst [vmem:[#allocation15] sm:$0xff] %v2283_v18  ;;  %v5158_v25 = vpop.f32.mrb[15].mxu0  ;;  %v5669_v20 = vld [vmem:[#allocation11 + $0x7c] ss:$28 sps:$4 sm:$0xff]  }
 0x410   :  { %v5667_v25 = vld [vmem:[#allocation11 + $0x78] ss:$28 sps:$4 sm:$0xff]  }
 0x411   :  { %v2290_v26 = vmul.f32 1.442695, %v2289_v24  ;;  %v5664_v24 = vld [vmem:[#allocation11 + $0x70] ss:$28 sps:$4 sm:$0xff]  }
 0x413   :  { %5972 = vpow2.f32 %v2290_v26  ;;  %v5672_v26 = vld [vmem:[#allocation11 + $0xac] ss:$28 sps:$4 sm:$0xff]  }
 0x41d   :  { %v5973_v32 = vpop.eup %5972 }
 0x41e   :  { %2293 = vrot.lane.b32.xlu0 %v5973_v32, %s6228_s5  ;;  %v5676_v32 = vld [vmem:[#allocation11 + $0xe0] ss:$28 sps:$4 sm:$0xff]  }
 0x490   :  { %v2294_v46 = vpop.permute.xlu0 %2293 }
 0x491   :  { %v2296_v47 = vmul.f32 %v2294_v46, %v2288_v45  ;;  %v5699_v45 = vld [vmem:[#allocation11 + $0x194] ss:$28 sps:$4 sm:$0xff]   ;;  %v5694_v46 = vld [vmem:[#allocation11 + $0x188] ss:$28 sps:$4 sm:$0xff]  }
 0x493   :  { %v2297_v48 = vadd.f32 %v2296_v47, %v2283_v18  ;;  %v5661_v18 = vld [vmem:[#allocation11 + $0x40] ss:$28 sps:$4 sm:$0xff]   ;;  %v5697_v47 = vld [vmem:[#allocation11 + $0x190] ss:$28 sps:$4 sm:$0xff]  }
 0x495   :  { %v2298_v50 = vpack.c.bf16 %v2297_v48, %v2297_v48  ;;  %v5702_v48 = vld [vmem:[#allocation11 + $0x1c4] ss:$28 sps:$4 sm:$0xff]  }
 0x497   :  { %5162 = vmatmul.mubr.msk.bf16.vlgmr.msra.gmra.mrb[8].mxu1 %vm2301_vm2, %v2298_v50  ;;  %v5700_v50 = vld [vmem:[#allocation11 + $0x1c0] ss:$28 sps:$4 sm:$0xff]  }
 0x498   :  { %2567 = vmatpush1.bf16.msra.mxu1 %v5604_v49  ;;  %2598 = vmatprep.mubr.bf16.mxu1 %v6225_v17  ;;  %v5640_v17 = vld [vmem:[#allocation10 + $0xc0] ss:$16 sps:$4 sm:$0xff]   ;;  %v5705_v49 = vld [vmem:[#allocation11 + $0x1cc] ss:$28 sps:$4 sm:$0xff]  }
 0x499   :  { %2568 = vmatprep.subr.bf16.mxu1 %v5612_v51  ;;  %v5703_v51 = vld [vmem:[#allocation11 + $0x1c8] ss:$28 sps:$4 sm:$0xff]  }
 0x49c   :  { %2569 = vmatpush1.bf16.msra.mxu1 %v5610_v52  ;;  %v5708_v52 = vld [vmem:[#allocation11 + $0x1fc] ss:$28 sps:$4 sm:$0xff]  }
 0x49d   :  { %2570 = vmatprep.subr.bf16.mxu1 %v5618_v53  ;;  %v5711_v53 = vld [vmem:[#allocation11 + $0x204] ss:$28 sps:$4 sm:$0xff]  }
 0x4a0   :  { %2571 = vmatpush1.bf16.msra.mxu1 %v5616_v54  ;;  %v5706_v54 = vld [vmem:[#allocation11 + $0x1f8] ss:$28 sps:$4 sm:$0xff]  }
 0x4a1   :  { %2572 = vmatprep.subr.bf16.mxu1 %v5624_v55  ;;  %v5709_v55 = vld [vmem:[#allocation11 + $0x200] ss:$28 sps:$4 sm:$0xff]  }
 0x4a4   :  { %2573 = vmatpush1.bf16.msra.mxu1 %v5622_v56  ;;  %v5714_v56 = vld [vmem:[#allocation11 + $0x234] ss:$28 sps:$4 sm:$0xff]  }
 0x4a5   :  { %2574 = vmatprep.subr.bf16.mxu1 %v5630_v57  ;;  %v5717_v57 = vld [vmem:[#allocation11 + $0x23c] ss:$28 sps:$4 sm:$0xff]  }
 0x4a8   :  { %2575 = vmatpush1.bf16.msra.mxu1 %v5628_v58  ;;  %v5712_v58 = vld [vmem:[#allocation11 + $0x230] ss:$28 sps:$4 sm:$0xff]  }
 0x4a9   :  { %2576 = vmatprep.subr.bf16.mxu1 %v5636_v59  ;;  %v5715_v59 = vld [vmem:[#allocation11 + $0x238] ss:$28 sps:$4 sm:$0xff]  }
 0x4ac   :  { %2577 = vmatpush1.bf16.msra.mxu1 %v5634_v60  ;;  %v5720_v60 = vld [vmem:[#allocation11 + $0x26c] ss:$28 sps:$4 sm:$0xff]  }
 0x4ad   :  { %2578 = vmatprep.subr.bf16.mxu1 %v5642_v61  ;;  %v5723_v61 = vld [vmem:[#allocation11 + $0x274] ss:$28 sps:$4 sm:$0xff]  }
 0x4b0   :  { %2579 = vmatpush1.bf16.msra.mxu1 %v5640_v17  ;;  %v5718_v17 = vld [vmem:[#allocation11 + $0x268] ss:$28 sps:$4 sm:$0xff]  }
 0x4b1   :  { %2580 = vmatprep.subr.bf16.mxu1 %v5648_v62  ;;  %v5721_v62 = vld [vmem:[#allocation11 + $0x270] ss:$28 sps:$4 sm:$0xff]  }
 0x4b4   :  { %2581 = vmatpush1.bf16.msra.mxu1 %v5646_v0  ;;  %v5729_v0 = vld [vmem:[#allocation11 + $0x2ac] ss:$28 sps:$4 sm:$0xff]  }
 0x4b5   :  { %4104 = vmatprep.subr.bf16.mxu1 %v5654_v2  ;;  %v5727_v2 = vld [vmem:[#allocation11 + $0x2a8] ss:$28 sps:$4 sm:$0xff]  }
 0x56a   :  { %v2343_v5 = vpop.f32.mrb[8].mxu1 }
 0x56b   :  { %v2344_v6 = vadd.f32 %v2343_v5, %v2300_v4  ;;  %v5163_v7 = vpop.f32.mrb[9].mxu1  ;;  %v5735_v4 = vld [vmem:[#allocation11 + $0x2e4] ss:$28 sps:$4 sm:$0xff]   ;;  %v5730_v5 = vld [vmem:[#allocation11 + $0x2d8] ss:$28 sps:$4 sm:$0xff]  }
 0x56c   :  { %v2346_v8 = vpop.f32.mrb[10].mxu1  ;;  %v5738_v7 = vld [vmem:[#allocation11 + $0x314] ss:$28 sps:$4 sm:$0xff]  }
 0x56d   :  { %v2349_v9 = vmax.f32 %v2344_v6, 0.0  ;;  %v5164_v10 = vpop.f32.mrb[11].mxu1  ;;  %v5733_v6 = vld [vmem:[#allocation11 + $0x2e0] ss:$28 sps:$4 sm:$0xff]  }
 0x56e   :  { %v5741_v8 = vld [vmem:[#allocation11 + $0x31c] ss:$28 sps:$4 sm:$0xff]  }
 0x56f   :  { %v2350_v13 = vpack.c.bf16 %v2349_v9, %v2349_v9  ;;  %v5736_v9 = vld [vmem:[#allocation11 + $0x310] ss:$28 sps:$4 sm:$0xff]   ;;  %v5739_v10 = vld [vmem:[#allocation11 + $0x318] ss:$28 sps:$4 sm:$0xff]  }
 0x571   :  { %2599 = vmatmul.mubr.bf16.vlgmr.msra.gmra.mrb[12].mxu1 %v2350_v13  ;;  %2640 = vmatmul.mubr.bf16.vlgmr.msra.gmra.mrb[16].mxu0 %v2350_v13  ;;  %v5742_v13 = vld [vmem:[#allocation11 + $0x348] ss:$28 sps:$4 sm:$0xff]  }
 0x572   :  { %4105 = vmatpush1.bf16.msra.mxu1 %v5652_v11  ;;  %4187 = vmatpush1.bf16.msra.mxu0 %v5655_v12  ;;  %v5744_v11 = vld [vmem:[#allocation11 + $0x34c] ss:$28 sps:$4 sm:$0xff]   ;;  %v5747_v12 = vld [vmem:[#allocation11 + $0x354] ss:$28 sps:$4 sm:$0xff]  }
 0x573   :  { %4106 = vmatprep.subr.bf16.mxu1 %v5660_v14  ;;  %4188 = vmatprep.subr.bf16.mxu0 %v5663_v15  ;;  %v5745_v14 = vld [vmem:[#allocation11 + $0x350] ss:$28 sps:$4 sm:$0xff]   ;;  %v5750_v15 = vld [vmem:[#allocation11 + $0x384] ss:$28 sps:$4 sm:$0xff]  }
 0x576   :  { %4107 = vmatpush1.bf16.msra.mxu1 %v5658_v16  ;;  %4189 = vmatpush1.bf16.msra.mxu0 %v5661_v18  ;;  %v5753_v16 = vld [vmem:[#allocation11 + $0x38c] ss:$28 sps:$4 sm:$0xff]  }
 0x577   :  { %4108 = vmatprep.subr.bf16.mxu1 %v5666_v19  ;;  %4190 = vmatprep.subr.bf16.mxu0 %v5669_v20  ;;  %v6410_v18 = vld [vmem:[#allocation13 + $0x4] ss:$8 sm:$0xf] }
 0x578   :  { %v2389_v19 = vrot.slane %v6410_v18, %v6387_v22  ;;  %v2393_v20 = vrot.slane %v6410_v18, %v6390_v23 }
 0x57a   :  { %4109 = vmatpush1.bf16.msra.mxu1 %v5664_v24  ;;  %4191 = vmatpush1.bf16.msra.mxu0 %v5667_v25  ;;  %v2401_v24 = vrot.slane %v6410_v18, %v6398_v38 }
 0x57b   :  { %4110 = vmatprep.subr.bf16.mxu1 %v5672_v26  ;;  %4192 = vmatprep.subr.bf16.mxu0 %v5675_v27 }
 0x57e   :  { %4111 = vmatpush1.bf16.msra.mxu1 %v5670_v28  ;;  %4193 = vmatpush1.bf16.msra.mxu0 %v5673_v29 }
 0x57f   :  { %4112 = vmatprep.subr.bf16.mxu1 %v5678_v30  ;;  %4194 = vmatprep.subr.bf16.mxu0 %v5681_v31 }
 0x582   :  { %4113 = vmatpush1.bf16.msra.mxu1 %v5676_v32  ;;  %4195 = vmatpush1.bf16.msra.mxu0 %v5679_v33 }
 0x583   :  { %4114 = vmatprep.subr.bf16.mxu1 %v5684_v34  ;;  %4196 = vmatprep.subr.bf16.mxu0 %v5687_v35 }
 0x586   :  { %4115 = vmatpush1.bf16.msra.mxu1 %v5682_v36  ;;  %4197 = vmatpush1.bf16.msra.mxu0 %v5685_v39 }
 0x587   :  { %4116 = vmatprep.subr.bf16.mxu1 %v5690_v40  ;;  %4198 = vmatprep.subr.bf16.mxu0 %v5693_v41 }
 0x58a   :  { %4117 = vmatpush1.bf16.msra.mxu1 %v5688_v42  ;;  %4199 = vmatpush1.bf16.msra.mxu0 %v5691_v43  ;;  %v5748_v42 = vld [vmem:[#allocation11 + $0x380] ss:$28 sps:$4 sm:$0xff]   ;;  %v5751_v43 = vld [vmem:[#allocation11 + $0x388] ss:$28 sps:$4 sm:$0xff]  }
 0x58b   :  { %4118 = vmatprep.subr.bf16.mxu1 %v5696_v44  ;;  %4200 = vmatprep.subr.bf16.mxu0 %v5699_v45  ;;  %v5756_v45 = vld [vmem:[#allocation11 + $0x3bc] ss:$28 sps:$4 sm:$0xff]  }
 0x58e   :  { %4119 = vmatpush1.bf16.msra.mxu1 %v5694_v46  ;;  %4201 = vmatpush1.bf16.msra.mxu0 %v5697_v47  ;;  %v5759_v46 = vld [vmem:[#allocation11 + $0x3c4] ss:$28 sps:$4 sm:$0xff]  }
 0x58f   :  { %4120 = vmatprep.subr.bf16.mxu1 %v5702_v48  ;;  %4202 = vmatprep.subr.bf16.mxu0 %v5705_v49  ;;  %v5754_v48 = vld [vmem:[#allocation11 + $0x3b8] ss:$28 sps:$4 sm:$0xff]   ;;  %v5757_v49 = vld [vmem:[#allocation11 + $0x3c0] ss:$28 sps:$4 sm:$0xff]  }
 0x592   :  { %4121 = vmatpush1.bf16.msra.mxu1 %v5700_v50  ;;  %4203 = vmatpush1.bf16.msra.mxu0 %v5703_v51  ;;  %v5762_v50 = vld [vmem:[#allocation11 + $0x3f4] ss:$28 sps:$4 sm:$0xff]   ;;  %v5765_v51 = vld [vmem:[#allocation11 + $0x3fc] ss:$28 sps:$4 sm:$0xff]  }
 0x593   :  { %4122 = vmatprep.subr.bf16.mxu1 %v5708_v52  ;;  %4204 = vmatprep.subr.bf16.mxu0 %v5711_v53  ;;  %v5760_v52 = vld [vmem:[#allocation11 + $0x3f0] ss:$28 sps:$4 sm:$0xff]   ;;  %v5763_v53 = vld [vmem:[#allocation11 + $0x3f8] ss:$28 sps:$4 sm:$0xff]  }
 0x596   :  { %4123 = vmatpush1.bf16.msra.mxu1 %v5706_v54  ;;  %4205 = vmatpush1.bf16.msra.mxu0 %v5709_v55  ;;  %v5768_v54 = vld [vmem:[#allocation11 + $0x42c] ss:$28 sps:$4 sm:$0xff]   ;;  %v5771_v55 = vld [vmem:[#allocation11 + $0x434] ss:$28 sps:$4 sm:$0xff]  }
 0x597   :  { %4124 = vmatprep.subr.bf16.mxu1 %v5714_v56  ;;  %4206 = vmatprep.subr.bf16.mxu0 %v5717_v57  ;;  %v5766_v56 = vld [vmem:[#allocation11 + $0x428] ss:$28 sps:$4 sm:$0xff]   ;;  %v5769_v57 = vld [vmem:[#allocation11 + $0x430] ss:$28 sps:$4 sm:$0xff]  }
 0x59a   :  { %4125 = vmatpush1.bf16.msra.mxu1 %v5712_v58  ;;  %4207 = vmatpush1.bf16.msra.mxu0 %v5715_v59  ;;  %v5774_v58 = vld [vmem:[#allocation11 + $0x464] ss:$28 sps:$4 sm:$0xff]   ;;  %v5777_v59 = vld [vmem:[#allocation11 + $0x46c] ss:$28 sps:$4 sm:$0xff]  }
 0x59b   :  { %4126 = vmatprep.subr.bf16.mxu1 %v5720_v60  ;;  %4208 = vmatprep.subr.bf16.mxu0 %v5723_v61  ;;  %v5772_v60 = vld [vmem:[#allocation11 + $0x460] ss:$28 sps:$4 sm:$0xff]   ;;  %v5775_v61 = vld [vmem:[#allocation11 + $0x468] ss:$28 sps:$4 sm:$0xff]  }
 0x59e   :  { %4127 = vmatpush1.bf16.msra.mxu1 %v5718_v17  ;;  %4209 = vmatpush1.bf16.msra.mxu0 %v5721_v62  ;;  %v5780_v17 = vld [vmem:[#allocation11 + $0x49c] ss:$28 sps:$4 sm:$0xff]   ;;  %v5783_v62 = vld [vmem:[#allocation11 + $0x4a4] ss:$28 sps:$4 sm:$0xff]  }
 0x59f   :  { %4128 = vmatprep.subr.bf16.mxu1 %v5726_v63  ;;  %4210 = vmatprep.subr.bf16.mxu0 %v5729_v0  ;;  %v5778_v63 = vld [vmem:[#allocation11 + $0x498] ss:$28 sps:$4 sm:$0xff]   ;;  %v5781_v0 = vld [vmem:[#allocation11 + $0x4a0] ss:$28 sps:$4 sm:$0xff]  }
 0x5a2   :  { %4129 = vmatpush1.bf16.msra.mxu1 %v5724_v1  ;;  %4211 = vmatpush1.bf16.msra.mxu0 %v5727_v2  ;;  %v5786_v1 = vld [vmem:[#allocation11 + $0x4d4] ss:$28 sps:$4 sm:$0xff]   ;;  %v5789_v2 = vld [vmem:[#allocation11 + $0x4dc] ss:$28 sps:$4 sm:$0xff]  }
 0x5a3   :  { %4130 = vmatprep.subr.bf16.mxu1 %v5732_v3  ;;  %4212 = vmatprep.subr.bf16.mxu0 %v5735_v4  ;;  %v5784_v3 = vld [vmem:[#allocation11 + $0x4d0] ss:$28 sps:$4 sm:$0xff]   ;;  %v5787_v4 = vld [vmem:[#allocation11 + $0x4d8] ss:$28 sps:$4 sm:$0xff]  }
 0x5a6   :  { %4131 = vmatpush1.bf16.msra.mxu1 %v5730_v5  ;;  %4213 = vmatpush1.bf16.msra.mxu0 %v5733_v6  ;;  %v5792_v5 = vld [vmem:[#allocation11 + $0x50c] ss:$28 sps:$4 sm:$0xff]   ;;  %v5795_v6 = vld [vmem:[#allocation11 + $0x514] ss:$28 sps:$4 sm:$0xff]  }
 0x5a7   :  { %4132 = vmatprep.subr.bf16.mxu1 %v5738_v7  ;;  %4214 = vmatprep.subr.bf16.mxu0 %v5741_v8  ;;  %v5790_v7 = vld [vmem:[#allocation11 + $0x508] ss:$28 sps:$4 sm:$0xff]   ;;  %v5793_v8 = vld [vmem:[#allocation11 + $0x510] ss:$28 sps:$4 sm:$0xff]  }
 0x5aa   :  { %4133 = vmatpush1.bf16.msra.mxu1 %v5736_v9  ;;  %4215 = vmatpush1.bf16.msra.mxu0 %v5739_v10  ;;  %v5798_v9 = vld [vmem:[#allocation11 + $0x544] ss:$28 sps:$4 sm:$0xff]   ;;  %v5801_v10 = vld [vmem:[#allocation11 + $0x54c] ss:$28 sps:$4 sm:$0xff]  }
 0x5ab   :  { %4134 = vmatprep.subr.bf16.mxu1 %v5744_v11  ;;  %4216 = vmatprep.subr.bf16.mxu0 %v5747_v12  ;;  %v5796_v11 = vld [vmem:[#allocation11 + $0x540] ss:$28 sps:$4 sm:$0xff]   ;;  %v5799_v12 = vld [vmem:[#allocation11 + $0x548] ss:$28 sps:$4 sm:$0xff]  }
 0x5ae   :  { %4135 = vmatpush1.bf16.msra.mxu1 %v5742_v13  ;;  %4217 = vmatpush1.bf16.msra.mxu0 %v5745_v14  ;;  %v5804_v13 = vld [vmem:[#allocation11 + $0x57c] ss:$28 sps:$4 sm:$0xff]   ;;  %v5807_v14 = vld [vmem:[#allocation11 + $0x584] ss:$28 sps:$4 sm:$0xff]  }
 0x5af   :  { %4145 = vmatprep.subr.bf16.mxu1 %v5750_v15  ;;  %4227 = vmatprep.subr.bf16.mxu0 %v5753_v16  ;;  %v5802_v15 = vld [vmem:[#allocation11 + $0x578] ss:$28 sps:$4 sm:$0xff]   ;;  %v5805_v16 = vld [vmem:[#allocation11 + $0x580] ss:$28 sps:$4 sm:$0xff]  }
 0x644   :  { %v2600_v25 = vpop.f32.mrb[12].mxu1  ;;  %v6418_v26 = vpop.f32.mrb[16].mxu0 }
 0x645   :  { %v2601_v27 = vadd.f32 %v2600_v25, %v2389_v19  ;;  %v2602_v28 = vpop.f32.mrb[13].mxu1  ;;  %v2643_v29 = vpop.f32.mrb[17].mxu0  ;;  %v5810_v19 = vld [vmem:[#allocation11 + $0x5b4] ss:$28 sps:$4 sm:$0xff]  }
 0x646   :  { %v2603_v30 = vadd.f32 %v2602_v28, %v2393_v20  ;;  %v2644_v31 = vadd.f32 %v2643_v29, %v2401_v24  ;;  %v2604_v32 = vpop.f32.mrb[14].mxu1  ;;  %v2645_v33 = vpop.f32.mrb[18].mxu0  ;;  %v5813_v20 = vld [vmem:[#allocation11 + $0x5bc] ss:$28 sps:$4 sm:$0xff]   ;;  %v5808_v24 = vld [vmem:[#allocation11 + $0x5b0] ss:$28 sps:$4 sm:$0xff]  }
 0x647   :  { %v2648_v34 = vmax.f32 %v2601_v27, 0.0  ;;  %v2605_v35 = vpop.f32.mrb[15].mxu1  ;;  %v2646_v36 = vpop.f32.mrb[19].mxu0  ;;  %v5811_v25 = vld [vmem:[#allocation11 + $0x5b8] ss:$28 sps:$4 sm:$0xff]  }
 0x648   :  { %v2649_v39 = vmax.f32 %v2603_v30, 0.0  ;;  %v2651_v40 = vmax.f32 %v2644_v31, 0.0  ;;  %v5816_v27 = vld [vmem:[#allocation11 + $0x5ec] ss:$28 sps:$4 sm:$0xff]   ;;  %v5819_v28 = vld [vmem:[#allocation11 + $0x5f4] ss:$28 sps:$4 sm:$0xff]  }
 0x649   :  { %v6422_v44 = vpack.c.bf16 %v2648_v34, %v2648_v34  ;;  %v5814_v29 = vld [vmem:[#allocation11 + $0x5e8] ss:$28 sps:$4 sm:$0xff]   ;;  %v5817_v30 = vld [vmem:[#allocation11 + $0x5f0] ss:$28 sps:$4 sm:$0xff]   ;;  %v5820_v33 = vld [vmem:[#allocation11 + $0x620] ss:$28 sps:$4 sm:$0xff]  }
 0x64a   :  { %v6420_v41 = vpack.c.bf16 %v2649_v39, %v2649_v39  ;;  %v6426_v47 = vpack.c.bf16 %v2651_v40, %v2651_v40  ;;  %v5822_v31 = vld [vmem:[#allocation11 + $0x624] ss:$28 sps:$4 sm:$0xff]   ;;  %v5825_v32 = vld [vmem:[#allocation11 + $0x62c] ss:$28 sps:$4 sm:$0xff]   ;;  %v5828_v35 = vld [vmem:[#allocation11 + $0x65c] ss:$28 sps:$4 sm:$0xff]  }
 0x64b   :  { %v5823_v34 = vld [vmem:[#allocation11 + $0x628] ss:$28 sps:$4 sm:$0xff]   ;;  %v5826_v39 = vld [vmem:[#allocation11 + $0x658] ss:$28 sps:$4 sm:$0xff]   ;;  %v5829_v40 = vld [vmem:[#allocation11 + $0x660] ss:$28 sps:$4 sm:$0xff]  }
 0x64c   :  { %4136 = vmatprep.mubr.bf16.mxu1 %v6420_v41  ;;  %4218 = vmatprep.mubr.bf16.mxu0 %v6420_v41  ;;  %v5831_v36 = vld [vmem:[#allocation11 + $0x664] ss:$28 sps:$4 sm:$0xff]  }
 0x64d   :  { %4137 = vmatmul.mubr.bf16.vlgmr.msra.gmra.mrb[16].mxu1 %v6422_v44  ;;  %4219 = vmatmul.mubr.bf16.vlgmr.msra.gmra.mrb[20].mxu0 %v6422_v44 }
 0x64e   :  { %4146 = vmatpush1.bf16.msra.mxu1 %v5748_v42  ;;  %4228 = vmatpush1.bf16.msra.mxu0 %v5751_v43  ;;  %v2397_v42 = vrot.slane %v6410_v18, %v6395_v37  ;;  %v5834_v43 = vld [vmem:[#allocation11 + $0x694] ss:$28 sps:$4 sm:$0xff]  }
 0x64f   :  { %4177 = vmatprep.mubr.bf16.mxu1 %v6426_v47  ;;  %4259 = vmatprep.mubr.bf16.mxu0 %v6426_v47  ;;  %v5846_v18 = vld [vmem:[#allocation11 + $0x14] ss:$28 sps:$4 sm:$0xff]  }
 0x650   :  { %4147 = vmatprep.subr.bf16.mxu1 %v5756_v45  ;;  %4229 = vmatprep.subr.bf16.mxu0 %v5759_v46  ;;  %v5837_v45 = vld [vmem:[#allocation11 + $0x69c] ss:$28 sps:$4 sm:$0xff]   ;;  %v5832_v46 = vld [vmem:[#allocation11 + $0x690] ss:$28 sps:$4 sm:$0xff]  }
 0x652   :  { %4148 = vmatpush1.bf16.msra.mxu1 %v5754_v48  ;;  %4230 = vmatpush1.bf16.msra.mxu0 %v5757_v49  ;;  %v5835_v48 = vld [vmem:[#allocation11 + $0x698] ss:$28 sps:$4 sm:$0xff]   ;;  %v2642_v49 = vadd.f32 %v6418_v26, %v2397_v42  ;;  %v5902_v42 = vld [vmem:[#allocation11 + $0x600] ss:$28 sps:$4 sm:$0xff]  }
 0x653   :  { %4149 = vmatprep.subr.bf16.mxu1 %v5762_v50  ;;  %4231 = vmatprep.subr.bf16.mxu0 %v5765_v51  ;;  %v5840_v50 = vld [vmem:[#allocation11 + $0x6cc] ss:$28 sps:$4 sm:$0xff]   ;;  %v5843_v51 = vld [vmem:[#allocation11 + $0x6d4] ss:$28 sps:$4 sm:$0xff]  }
 0x654   :  { %v5848_v26 = vld [vmem:[#allocation11 + $0x18] ss:$28 sps:$4 sm:$0xff]  }
 0x656   :  { %4150 = vmatpush1.bf16.msra.mxu1 %v5760_v52  ;;  %4232 = vmatpush1.bf16.msra.mxu0 %v5763_v53  ;;  %v5838_v52 = vld [vmem:[#allocation11 + $0x6c8] ss:$28 sps:$4 sm:$0xff]   ;;  %v5841_v53 = vld [vmem:[#allocation11 + $0x6d0] ss:$28 sps:$4 sm:$0xff]  }
 0x657   :  { %4151 = vmatprep.subr.bf16.mxu1 %v5768_v54  ;;  %4233 = vmatprep.subr.bf16.mxu0 %v5771_v55  ;;  %v2650_v54 = vmax.f32 %v2642_v49, 0.0  ;;  %v5847_v55 = vld [vmem:[#allocation11 + $0x1d8] ss:$28 sps:$4 sm:$0xff]   ;;  %v5904_v49 = vld [vmem:[#allocation11 + $0x2b0] ss:$28 sps:$4 sm:$0xff]  }
 0x65a   :  { %4152 = vmatpush1.bf16.msra.mxu1 %v5766_v56  ;;  %4234 = vmatpush1.bf16.msra.mxu0 %v5769_v57  ;;  %v5844_v56 = vld [vmem:[#allocation11 + $0x10] ss:$28 sps:$4 sm:$0xff]   ;;  %v6435_v57 = vpack.c.bf16 %v2650_v54, %v2650_v54 }
 0x65b   :  { %4153 = vmatprep.subr.bf16.mxu1 %v5774_v58  ;;  %4235 = vmatprep.subr.bf16.mxu0 %v5777_v59  ;;  %v5851_v58 = vld [vmem:[#allocation11 + $0x4c] ss:$28 sps:$4 sm:$0xff]  }
 0x65c   :  { %v5852_v59 = vld [vmem:[#allocation11 + $0x210] ss:$28 sps:$4 sm:$0xff]  }
 0x65d   :  { %v5913_v54 = vld [vmem:[#allocation11 + $0x4b0] ss:$28 sps:$4 sm:$0xff]  }
 0x65e   :  { %4154 = vmatpush1.bf16.msra.mxu1 %v5772_v60  ;;  %4236 = vmatpush1.bf16.msra.mxu0 %v5775_v61  ;;  %v5849_v60 = vld [vmem:[#allocation11 + $0x48] ss:$28 sps:$4 sm:$0xff]   ;;  %v5853_v61 = vld [vmem:[#allocation11 + $0x50] ss:$28 sps:$4 sm:$0xff]  }
 0x65f   :  { %4155 = vmatprep.subr.bf16.mxu1 %v5780_v17  ;;  %4237 = vmatprep.subr.bf16.mxu0 %v5783_v62  ;;  %v5856_v17 = vld [vmem:[#allocation11 + $0x84] ss:$28 sps:$4 sm:$0xff]  }
 0x660   :  { %v5857_v62 = vld [vmem:[#allocation11 + $0x248] ss:$28 sps:$4 sm:$0xff]  }
 0x662   :  { %4156 = vmatpush1.bf16.msra.mxu1 %v5778_v63  ;;  %4238 = vmatpush1.bf16.msra.mxu0 %v5781_v0  ;;  %v5854_v63 = vld [vmem:[#allocation11 + $0x80] ss:$28 sps:$4 sm:$0xff]   ;;  %v5858_v0 = vld [vmem:[#allocation11 + $0x88] ss:$28 sps:$4 sm:$0xff]  }
 0x663   :  { %4157 = vmatprep.subr.bf16.mxu1 %v5786_v1  ;;  %4239 = vmatprep.subr.bf16.mxu0 %v5789_v2  ;;  %v5861_v1 = vld [vmem:[#allocation11 + $0xbc] ss:$28 sps:$4 sm:$0xff]  }
 0x664   :  { %v5862_v2 = vld [vmem:[#allocation11 + $0x280] ss:$28 sps:$4 sm:$0xff]  }
 0x666   :  { %4158 = vmatpush1.bf16.msra.mxu1 %v5784_v3  ;;  %4240 = vmatpush1.bf16.msra.mxu0 %v5787_v4  ;;  %v5859_v3 = vld [vmem:[#allocation11 + $0xb8] ss:$28 sps:$4 sm:$0xff]   ;;  %v5863_v4 = vld [vmem:[#allocation11 + $0xc0] ss:$28 sps:$4 sm:$0xff]  }
 0x667   :  { %4159 = vmatprep.subr.bf16.mxu1 %v5792_v5  ;;  %4241 = vmatprep.subr.bf16.mxu0 %v5795_v6  ;;  %v5866_v5 = vld [vmem:[#allocation11 + $0xf4] ss:$28 sps:$4 sm:$0xff]  }
 0x668   :  { %v5864_v6 = vld [vmem:[#allocation11 + $0xf0] ss:$28 sps:$4 sm:$0xff]  }
 0x66a   :  { %4160 = vmatpush1.bf16.msra.mxu1 %v5790_v7  ;;  %4242 = vmatpush1.bf16.msra.mxu0 %v5793_v8  ;;  %v5868_v7 = vld [vmem:[#allocation11 + $0xf8] ss:$28 sps:$4 sm:$0xff]   ;;  %v5871_v8 = vld [vmem:[#allocation11 + $0x12c] ss:$28 sps:$4 sm:$0xff]  }
 0x66b   :  { %4161 = vmatprep.subr.bf16.mxu1 %v5798_v9  ;;  %4243 = vmatprep.subr.bf16.mxu0 %v5801_v10  ;;  %v5872_v9 = vld [vmem:[#allocation11 + $0x2f0] ss:$28 sps:$4 sm:$0xff]   ;;  %v5869_v10 = vld [vmem:[#allocation11 + $0x128] ss:$28 sps:$4 sm:$0xff]  }
 0x66e   :  { %4162 = vmatpush1.bf16.msra.mxu1 %v5796_v11  ;;  %4244 = vmatpush1.bf16.msra.mxu0 %v5799_v12  ;;  %v5873_v11 = vld [vmem:[#allocation11 + $0x130] ss:$28 sps:$4 sm:$0xff]   ;;  %v5876_v12 = vld [vmem:[#allocation11 + $0x164] ss:$28 sps:$4 sm:$0xff]  }
 0x66f   :  { %4163 = vmatprep.subr.bf16.mxu1 %v5804_v13  ;;  %4245 = vmatprep.subr.bf16.mxu0 %v5807_v14  ;;  %v5877_v13 = vld [vmem:[#allocation11 + $0x328] ss:$28 sps:$4 sm:$0xff]   ;;  %v5874_v14 = vld [vmem:[#allocation11 + $0x160] ss:$28 sps:$4 sm:$0xff]  }
 0x672   :  { %4164 = vmatpush1.bf16.msra.mxu1 %v5802_v15  ;;  %4246 = vmatpush1.bf16.msra.mxu0 %v5805_v16  ;;  %v5878_v15 = vld [vmem:[#allocation11 + $0x168] ss:$28 sps:$4 sm:$0xff]   ;;  %v5881_v16 = vld [vmem:[#allocation11 + $0x19c] ss:$28 sps:$4 sm:$0xff]  }
 0x673   :  { %4165 = vmatprep.subr.bf16.mxu1 %v5810_v19  ;;  %4247 = vmatprep.subr.bf16.mxu0 %v5813_v20  ;;  %v5882_v19 = vld [vmem:[#allocation11 + $0x360] ss:$28 sps:$4 sm:$0xff]   ;;  %v5879_v20 = vld [vmem:[#allocation11 + $0x198] ss:$28 sps:$4 sm:$0xff]  }
 0x676   :  { %4166 = vmatpush1.bf16.msra.mxu1 %v5808_v24  ;;  %4248 = vmatpush1.bf16.msra.mxu0 %v5811_v25  ;;  %v5883_v24 = vld [vmem:[#allocation11 + $0x1a0] ss:$28 sps:$4 sm:$0xff]   ;;  %v5886_v25 = vld [vmem:[#allocation11 + $0x1d4] ss:$28 sps:$4 sm:$0xff]  }
 0x677   :  { %4167 = vmatprep.subr.bf16.mxu1 %v5816_v27  ;;  %4249 = vmatprep.subr.bf16.mxu0 %v5819_v28  ;;  %v5887_v27 = vld [vmem:[#allocation11 + $0x558] ss:$28 sps:$4 sm:$0xff]   ;;  %v5884_v28 = vld [vmem:[#allocation11 + $0x1d0] ss:$28 sps:$4 sm:$0xff]  }
 0x67a   :  { %4168 = vmatpush1.bf16.msra.mxu1 %v5814_v29  ;;  %4250 = vmatpush1.bf16.msra.mxu0 %v5817_v30  ;;  %v5888_v29 = vld [vmem:[#allocation11 + $0x398] ss:$28 sps:$4 sm:$0xff]   ;;  %v5891_v30 = vld [vmem:[#allocation11 + $0x20c] ss:$28 sps:$4 sm:$0xff]  }
 0x67b   :  { %4169 = vmatprep.subr.bf16.mxu1 %v5822_v31  ;;  %4251 = vmatprep.subr.bf16.mxu0 %v5825_v32  ;;  %v5892_v31 = vld [vmem:[#allocation11 + $0x590] ss:$28 sps:$4 sm:$0xff]   ;;  %v5889_v32 = vld [vmem:[#allocation11 + $0x208] ss:$28 sps:$4 sm:$0xff]  }
 0x67e   :  { %4170 = vmatpush1.bf16.msra.mxu1 %v5820_v33  ;;  %4252 = vmatpush1.bf16.msra.mxu0 %v5823_v34  ;;  %v5893_v33 = vld [vmem:[#allocation11 + $0x3d0] ss:$28 sps:$4 sm:$0xff]   ;;  %v5896_v34 = vld [vmem:[#allocation11 + $0x244] ss:$28 sps:$4 sm:$0xff]  }
 0x67f   :  { %4171 = vmatprep.subr.bf16.mxu1 %v5828_v35  ;;  %4253 = vmatprep.subr.bf16.mxu0 %v5831_v36  ;;  %v5897_v35 = vld [vmem:[#allocation11 + $0x5c8] ss:$28 sps:$4 sm:$0xff]   ;;  %v5894_v36 = vld [vmem:[#allocation11 + $0x240] ss:$28 sps:$4 sm:$0xff]  }
 0x682   :  { %4172 = vmatpush1.bf16.msra.mxu1 %v5826_v39  ;;  %4254 = vmatpush1.bf16.msra.mxu0 %v5829_v40  ;;  %v5898_v39 = vld [vmem:[#allocation11 + $0x408] ss:$28 sps:$4 sm:$0xff]   ;;  %v5901_v40 = vld [vmem:[#allocation11 + $0x27c] ss:$28 sps:$4 sm:$0xff]  }
 0x683   :  { %4173 = vmatprep.subr.bf16.mxu1 %v5834_v43  ;;  %4255 = vmatprep.subr.bf16.mxu0 %v5837_v45  ;;  %v5899_v43 = vld [vmem:[#allocation11 + $0x278] ss:$28 sps:$4 sm:$0xff]   ;;  %v5903_v45 = vld [vmem:[#allocation11 + $0x440] ss:$28 sps:$4 sm:$0xff]  }
 0x686   :  { %4174 = vmatpush1.bf16.msra.mxu1 %v5832_v46  ;;  %4256 = vmatpush1.bf16.msra.mxu0 %v5835_v48  ;;  %v5906_v46 = vld [vmem:[#allocation11 + $0x2b4] ss:$28 sps:$4 sm:$0xff]  }
 0x687   :  { %4175 = vmatprep.subr.bf16.mxu1 %v5840_v50  ;;  %4257 = vmatprep.subr.bf16.mxu0 %v5843_v51  ;;  %v5907_v48 = vld [vmem:[#allocation11 + $0x638] ss:$28 sps:$4 sm:$0xff]   ;;  %v5911_v51 = vld [vmem:[#allocation11 + $0x2ec] ss:$28 sps:$4 sm:$0xff]  }
 0x688   :  { %v5908_v50 = vld [vmem:[#allocation11 + $0x478] ss:$28 sps:$4 sm:$0xff]  }
 0x68a   :  { %4176 = vmatpush1.bf16.msra.mxu1 %v5838_v52  ;;  %4258 = vmatpush1.bf16.msra.mxu0 %v5841_v53  ;;  %v5912_v52 = vld [vmem:[#allocation11 + $0x670] ss:$28 sps:$4 sm:$0xff]   ;;  %v5909_v53 = vld [vmem:[#allocation11 + $0x2e8] ss:$28 sps:$4 sm:$0xff]  }
 0x68b   :  { %4268 = vmatprep.subr.bf16.mxu1 %v5846_v18  ;;  %5095 = vmatprep.subr.bf16.mxu0 %v5847_v55  ;;  %v5916_v18 = vld [vmem:[#allocation11 + $0x324] ss:$28 sps:$4 sm:$0xff]  }
 0x68c   :  { %v5917_v55 = vld [vmem:[#allocation11 + $0x6a8] ss:$28 sps:$4 sm:$0xff]  }
 0x68d   :  { %4178 = vmatmul.mubr.bf16.vlgmr.msra.gmra.mrb[16].mxu1 %v6435_v57  ;;  %4260 = vmatmul.mubr.bf16.vlgmr.msra.gmra.mrb[20].mxu0 %v6435_v57 }
 0x68e   :  { %4269 = vmatpush1.bf16.msra.mxu1 %v5844_v56  ;;  %4300 = vmatprep.mubr.bf16.mxu1 %v6420_v41  ;;  %v5914_v56 = vld [vmem:[#allocation11 + $0x320] ss:$28 sps:$4 sm:$0xff]  }
 0x68f   :  { %5096 = vmatpush3.bf16.msra.mxu0 %v5848_v26  ;;  %4382 = vmatprep.mubr.bf16.mxu0 %v6420_v41  ;;  %v5867_v41 = vld [vmem:[#allocation11 + $0x2b8] ss:$28 sps:$4 sm:$0xff]   ;;  %v5918_v26 = vld [vmem:[#allocation11 + $0x4e8] ss:$28 sps:$4 sm:$0xff]  }
 0x690   :  { %4270 = vmatprep.subr.bf16.mxu1 %v5851_v58  ;;  %5097 = vmatprep.subr.bf16.mxu0 %v5852_v59  ;;  %v5921_v58 = vld [vmem:[#allocation11 + $0x35c] ss:$28 sps:$4 sm:$0xff]  }
 0x691   :  { %v5922_v59 = vld [vmem:[#allocation11 + $0x6e0] ss:$28 sps:$4 sm:$0xff]  }
 0x692   :  { %4271 = vmatpush1.bf16.msra.mxu1 %v5849_v60  ;;  %v5919_v60 = vld [vmem:[#allocation11 + $0x358] ss:$28 sps:$4 sm:$0xff]  }
 0x693   :  { %5098 = vmatpush3.bf16.msra.mxu0 %v5853_v61  ;;  %4272 = vmatprep.subr.bf16.mxu1 %v5856_v17  ;;  %v5923_v61 = vld [vmem:[#allocation11 + $0x520] ss:$28 sps:$4 sm:$0xff]   ;;  %v5926_v17 = vld [vmem:[#allocation11 + $0x394] ss:$28 sps:$4 sm:$0xff]  }
 0x694   :  { %5099 = vmatprep.subr.bf16.mxu0 %v5857_v62  ;;  %v5924_v62 = vld [vmem:[#allocation11 + $0x390] ss:$28 sps:$4 sm:$0xff]  }
 0x696   :  { %4273 = vmatpush1.bf16.msra.mxu1 %v5854_v63  ;;  %v5929_v63 = vld [vmem:[#allocation11 + $0x3cc] ss:$28 sps:$4 sm:$0xff]  }
 0x697   :  { %5100 = vmatpush3.bf16.msra.mxu0 %v5858_v0  ;;  %4274 = vmatprep.subr.bf16.mxu1 %v5861_v1  ;;  %v5927_v0 = vld [vmem:[#allocation11 + $0x3c8] ss:$28 sps:$4 sm:$0xff]  }
 0x698   :  { %5101 = vmatprep.subr.bf16.mxu0 %v5862_v2  ;;  %v5932_v1 = vld [vmem:[#allocation11 + $0x404] ss:$28 sps:$4 sm:$0xff]  }
 0x699   :  { %v5930_v2 = vld [vmem:[#allocation11 + $0x400] ss:$28 sps:$4 sm:$0xff]  }
 0x69a   :  { %4275 = vmatpush1.bf16.msra.mxu1 %v5859_v3  ;;  %v5935_v3 = vld [vmem:[#allocation11 + $0x43c] ss:$28 sps:$4 sm:$0xff]  }
 0x69b   :  { %5102 = vmatpush3.bf16.msra.mxu0 %v5863_v4  ;;  %4276 = vmatprep.subr.bf16.mxu1 %v5866_v5  ;;  %v5933_v4 = vld [vmem:[#allocation11 + $0x438] ss:$28 sps:$4 sm:$0xff]  }
 0x69c   :  { %5103 = vmatprep.subr.bf16.mxu0 %v5867_v41  ;;  %v5938_v5 = vld [vmem:[#allocation11 + $0x474] ss:$28 sps:$4 sm:$0xff]  }
 0x69d   :  { %v5936_v41 = vld [vmem:[#allocation11 + $0x470] ss:$28 sps:$4 sm:$0xff]  }
 0x69e   :  { %4277 = vmatpush1.bf16.msra.mxu1 %v5864_v6  ;;  %v5939_v6 = vld [vmem:[#allocation11 + $0x4a8] ss:$28 sps:$4 sm:$0xff]  }
 0x69f   :  { %5104 = vmatpush3.bf16.msra.mxu0 %v5868_v7  ;;  %4278 = vmatprep.subr.bf16.mxu1 %v5871_v8  ;;  %v5944_v7 = vld [vmem:[#allocation11 + $0x4e4] ss:$28 sps:$4 sm:$0xff]   ;;  %v5947_v8 = vld [vmem:[#allocation11 + $0x51c] ss:$28 sps:$4 sm:$0xff]  }
 0x6a0   :  { %5105 = vmatprep.subr.bf16.mxu0 %v5872_v9  ;;  %v5945_v9 = vld [vmem:[#allocation11 + $0x518] ss:$28 sps:$4 sm:$0xff]  }
 0x6a2   :  { %4279 = vmatpush1.bf16.msra.mxu1 %v5869_v10  ;;  %v5950_v10 = vld [vmem:[#allocation11 + $0x554] ss:$28 sps:$4 sm:$0xff]  }
 0x6a3   :  { %5106 = vmatpush3.bf16.msra.mxu0 %v5873_v11  ;;  %4280 = vmatprep.subr.bf16.mxu1 %v5876_v12  ;;  %v5948_v11 = vld [vmem:[#allocation11 + $0x550] ss:$28 sps:$4 sm:$0xff]  }
 0x6a4   :  { %5107 = vmatprep.subr.bf16.mxu0 %v5877_v13  ;;  %v5953_v12 = vld [vmem:[#allocation11 + $0x58c] ss:$28 sps:$4 sm:$0xff]  }
 0x6a5   :  { %v5951_v13 = vld [vmem:[#allocation11 + $0x588] ss:$28 sps:$4 sm:$0xff]  }
 0x6a6   :  { %4281 = vmatpush1.bf16.msra.mxu1 %v5874_v14  ;;  %v5956_v14 = vld [vmem:[#allocation11 + $0x5c4] ss:$28 sps:$4 sm:$0xff]  }
 0x6a7   :  { %5108 = vmatpush3.bf16.msra.mxu0 %v5878_v15  ;;  %4282 = vmatprep.subr.bf16.mxu1 %v5881_v16  ;;  %v5954_v15 = vld [vmem:[#allocation11 + $0x5c0] ss:$28 sps:$4 sm:$0xff]  }
 0x6a8   :  { %5109 = vmatprep.subr.bf16.mxu0 %v5882_v19  ;;  %v5959_v16 = vld [vmem:[#allocation11 + $0x5fc] ss:$28 sps:$4 sm:$0xff]  }
 0x6a9   :  { %v5957_v19 = vld [vmem:[#allocation11 + $0x5f8] ss:$28 sps:$4 sm:$0xff]  }
 0x6aa   :  { %4283 = vmatpush1.bf16.msra.mxu1 %v5879_v20  ;;  %v5962_v20 = vld [vmem:[#allocation11 + $0x634] ss:$28 sps:$4 sm:$0xff]  }
 0x6ab   :  { %5110 = vmatpush3.bf16.msra.mxu0 %v5883_v24  ;;  %4284 = vmatprep.subr.bf16.mxu1 %v5886_v25  ;;  %v5960_v24 = vld [vmem:[#allocation11 + $0x630] ss:$28 sps:$4 sm:$0xff]  }
 0x6ac   :  { %5117 = vmatprep.subr.bf16.mxu0 %v5887_v27  ;;  %v5965_v25 = vld [vmem:[#allocation11 + $0x66c] ss:$28 sps:$4 sm:$0xff]  }
 0x6ad   :  { %v5963_v27 = vld [vmem:[#allocation11 + $0x668] ss:$28 sps:$4 sm:$0xff]  }
 0x6ae   :  { %4383 = vmatmul.mubr.bf16.vlgmr.msra.gmra.mrb[24].mxu0 %v6422_v44  ;;  %4285 = vmatpush1.bf16.msra.mxu1 %v5884_v28  ;;  %v5968_v28 = vld [vmem:[#allocation11 + $0x6a4] ss:$28 sps:$4 sm:$0xff]  }
 0x6af   :  { %5118 = vmatpush3.bf16.msra.mxu0 %v5888_v29  ;;  %4422 = vmatprep.mubr.bf16.mxu0 %v6426_v47  ;;  %v5966_v29 = vld [vmem:[#allocation11 + $0x6a0] ss:$28 sps:$4 sm:$0xff]  }
 0x6b0   :  { %4286 = vmatprep.subr.bf16.mxu1 %v5891_v30  ;;  %5119 = vmatprep.subr.bf16.mxu0 %v5892_v31  ;;  %v5971_v30 = vld [vmem:[#allocation11 + $0x6dc] ss:$28 sps:$4 sm:$0xff]  }
 0x6b1   :  { %v5969_v31 = vld [vmem:[#allocation11 + $0x6d8] ss:$28 sps:$4 sm:$0xff]  }
 0x6b2   :  { %4287 = vmatpush1.bf16.msra.mxu1 %v5889_v32  ;;  %v2913_v32 = vld [vmem:[#allocation13 + $0x5] ss:$8 sm:$0xf] }
 0x6b3   :  { %5120 = vmatpush3.bf16.msra.mxu0 %v5893_v33  ;;  %4288 = vmatprep.subr.bf16.mxu1 %v5896_v34  ;;  %v2914_v33 = vld [vmem:[#allocation13 + $0x5] ss:$8 sm:$0xf0] }
 0x6b4   :  { %5121 = vmatprep.subr.bf16.mxu0 %v5897_v35  ;;  %v6447_v34 = vor.u32 %v2914_v33, %v2913_v32 }
 0x6b6   :  { %4289 = vmatpush1.bf16.msra.mxu1 %v5894_v36  ;;  %v2920_v35 = vrot.slane %v6447_v34, %v6387_v22  ;;  %v2928_v36 = vrot.slane %v6447_v34, %v6395_v37 }
 0x6b7   :  { %5122 = vmatpush3.bf16.msra.mxu0 %v5898_v39  ;;  %4290 = vmatprep.subr.bf16.mxu1 %v5901_v40  ;;  %v2924_v39 = vrot.slane %v6447_v34, %v6390_v23  ;;  %v2932_v40 = vrot.slane %v6447_v34, %v6398_v38 }
 0x6b8   :  { %5123 = vmatprep.subr.bf16.mxu0 %v5902_v42 }
 0x6ba   :  { %4291 = vmatpush1.bf16.msra.mxu1 %v5899_v43 }
 0x6bb   :  { %5124 = vmatpush3.bf16.msra.mxu0 %v5903_v45  ;;  %4292 = vmatprep.subr.bf16.mxu1 %v5906_v46 }
 0x6bc   :  { %5125 = vmatprep.subr.bf16.mxu0 %v5907_v48 }
 0x6be   :  { %4293 = vmatpush1.bf16.msra.mxu1 %v5904_v49 }
 0x6bf   :  { %5126 = vmatpush3.bf16.msra.mxu0 %v5908_v50  ;;  %4294 = vmatprep.subr.bf16.mxu1 %v5911_v51 }
 0x6c0   :  { %5127 = vmatprep.subr.bf16.mxu0 %v5912_v52 }
 0x6c2   :  { %4295 = vmatpush1.bf16.msra.mxu1 %v5909_v53 }
 0x6c3   :  { %5128 = vmatpush3.bf16.msra.mxu0 %v5913_v54  ;;  %4296 = vmatprep.subr.bf16.mxu1 %v5916_v18 }
 0x6c4   :  { %5129 = vmatprep.subr.bf16.mxu0 %v5917_v55 }
 0x6c6   :  { %4297 = vmatpush1.bf16.msra.mxu1 %v5914_v56 }
 0x6c7   :  { %5130 = vmatpush3.bf16.msra.mxu0 %v5918_v26  ;;  %4298 = vmatprep.subr.bf16.mxu1 %v5921_v58 }
 0x6c8   :  { %5131 = vmatprep.subr.bf16.mxu0 %v5922_v59 }
 0x6ca   :  { %4299 = vmatpush1.bf16.msra.mxu1 %v5919_v60 }
 0x6cb   :  { %5132 = vmatpush3.bf16.msra.mxu0 %v5923_v61  ;;  %4309 = vmatprep.subr.bf16.mxu1 %v5926_v17 }
 0x6cd   :  { %4301 = vmatmul.mubr.bf16.vlgmr.msra.gmra.mrb[20].mxu1 %v6422_v44  ;;  %v5941_v44 = vld [vmem:[#allocation11 + $0x4ac] ss:$28 sps:$4 sm:$0xff]  }
 0x6ce   :  { %4423 = vmatmul.mubr.bf16.vlgmr.msra.gmra.mrb[28].mxu0 %v6435_v57  ;;  %4310 = vmatpush1.bf16.msra.mxu1 %v5924_v62 }
 0x6cf   :  { %4341 = vmatprep.mubr.bf16.mxu1 %v6426_v47  ;;  %4311 = vmatprep.subr.bf16.mxu1 %v5929_v63  ;;  %v5942_v47 = vld [vmem:[#allocation11 + $0x4e0] ss:$28 sps:$4 sm:$0xff]  }
 0x6d2   :  { %4312 = vmatpush1.bf16.msra.mxu1 %v5927_v0 }
 0x6d3   :  { %4313 = vmatprep.subr.bf16.mxu1 %v5932_v1 }
 0x6d6   :  { %4314 = vmatpush1.bf16.msra.mxu1 %v5930_v2 }
 0x6d7   :  { %4315 = vmatprep.subr.bf16.mxu1 %v5935_v3 }
 0x6da   :  { %4316 = vmatpush1.bf16.msra.mxu1 %v5933_v4 }
 0x6db   :  { %4317 = vmatprep.subr.bf16.mxu1 %v5938_v5 }
 0x6de   :  { %4318 = vmatpush1.bf16.msra.mxu1 %v5936_v41 }
 0x6df   :  { %4319 = vmatprep.subr.bf16.mxu1 %v5941_v44 }
 0x6e2   :  { %4320 = vmatpush1.bf16.msra.mxu1 %v5939_v6 }
 0x6e3   :  { %4321 = vmatprep.subr.bf16.mxu1 %v5944_v7 }
 0x6e6   :  { %4322 = vmatpush1.bf16.msra.mxu1 %v5942_v47 }
 0x6e7   :  { %4323 = vmatprep.subr.bf16.mxu1 %v5947_v8 }
 0x6ea   :  { %4324 = vmatpush1.bf16.msra.mxu1 %v5945_v9 }
 0x6eb   :  { %4325 = vmatprep.subr.bf16.mxu1 %v5950_v10 }
 0x6ee   :  { %4326 = vmatpush1.bf16.msra.mxu1 %v5948_v11 }
 0x6ef   :  { %4327 = vmatprep.subr.bf16.mxu1 %v5953_v12 }
 0x6f2   :  { %4328 = vmatpush1.bf16.msra.mxu1 %v5951_v13 }
 0x6f3   :  { %4329 = vmatprep.subr.bf16.mxu1 %v5956_v14 }
 0x6f6   :  { %4330 = vmatpush1.bf16.msra.mxu1 %v5954_v15 }
 0x6f7   :  { %4331 = vmatprep.subr.bf16.mxu1 %v5959_v16 }
 0x6fa   :  { %4332 = vmatpush1.bf16.msra.mxu1 %v5957_v19 }
 0x6fb   :  { %4333 = vmatprep.subr.bf16.mxu1 %v5962_v20 }
 0x6fe   :  { %4334 = vmatpush1.bf16.msra.mxu1 %v5960_v24 }
 0x6ff   :  { %4335 = vmatprep.subr.bf16.mxu1 %v5965_v25 }
 0x702   :  { %4336 = vmatpush1.bf16.msra.mxu1 %v5963_v27 }
 0x703   :  { %4337 = vmatprep.subr.bf16.mxu1 %v5968_v28 }
 0x706   :  { %4338 = vmatpush1.bf16.msra.mxu1 %v5966_v29 }
 0x707   :  { %4339 = vmatprep.subr.bf16.mxu1 %v5971_v30 }
 0x70a   :  { %4340 = vmatpush1.bf16.msra.mxu1 %v5969_v31 }
 0x70d   :  { %4342 = vmatmul.mubr.bf16.vlgmr.msra.gmra.mrb[20].mxu1 %v6435_v57 }
 0x760   :  { %v4179_v42 = vpop.f32.mrb[16].mxu1  ;;  %v4261_v43 = vpop.f32.mrb[20].mxu0 }
 0x761   :  { %v5171_v45 = vadd.f32 %v4179_v42, %v2920_v35  ;;  %v5173_v57 = vadd.f32 %v4261_v43, %v2928_v36  ;;  %v4181_v46 = vpop.f32.mrb[17].mxu1  ;;  %v4263_v48 = vpop.f32.mrb[21].mxu0 }
 0x762   :  { %v5172_v49 = vadd.f32 %v4181_v46, %v2924_v39  ;;  %v5174_v50 = vadd.f32 %v4263_v48, %v2932_v40  ;;  %v4183_v51 = vpop.f32.mrb[18].mxu1  ;;  %v4265_v52 = vpop.f32.mrb[22].mxu0 }
 0x763   :  { %v5033_v22 = vmul.f32 -1.442695, %v5171_v45  ;;  %v5035_v53 = vmul.f32 -1.442695, %v5173_v57  ;;  %v4184_v54 = vpop.f32.mrb[19].mxu1  ;;  %v4266_v37 = vpop.f32.mrb[23].mxu0 }
 0x764   :  { %v5034_v18 = vmul.f32 -1.442695, %v5172_v49  ;;  %v5036_v55 = vmul.f32 -1.442695, %v5174_v50 }
 0x765   :  { %5974 = vpow2.f32 %v5033_v22 }
 0x766   :  { %5976 = vpow2.f32 %v5035_v53 }
 0x767   :  { %5978 = vpow2.f32 %v5034_v18 }
 0x768   :  { %5980 = vpow2.f32 %v5036_v55 }
 0x76f   :  { %v5975_v23 = vpop.eup %5974 }
 0x770   :  { %v5977_v38 = vpop.eup %5976  ;;  %v4451_v56 = vadd.f32 1.0, %v5975_v23 }
 0x771   :  { %v5979_v26 = vpop.eup %5978  ;;  %v4453_v58 = vadd.f32 1.0, %v5977_v38 }
 0x772   :  { %v5981_v59 = vpop.eup %5980  ;;  %5982 = vrcp.f32 %v4451_v56  ;;  %v4452_v60 = vadd.f32 1.0, %v5979_v26 }
 0x773   :  { %5984 = vrcp.f32 %v4453_v58  ;;  %v4454_v61 = vadd.f32 1.0, %v5981_v59 }
 0x774   :  { %5986 = vrcp.f32 %v4452_v60 }
 0x775   :  { %5988 = vrcp.f32 %v4454_v61 }
 0x77c   :  { %v5983_v17 = vpop.eup %5982 }
 0x77d   :  { %v5985_v62 = vpop.eup %5984  ;;  %4472 = vst [vmem:[#allocation14] sm:$0xff] %v5983_v17 }
 0x77e   :  { %v5987_v63 = vpop.eup %5986  ;;  %4474 = vst [vmem:[#allocation14 + $0x10] sm:$0xff] %v5985_v62 }
 0x77f   :  { %v5989_v0 = vpop.eup %5988  ;;  %4473 = vst [vmem:[#allocation14 + $0x8] sm:$0xff] %v5987_v63 }
 0x780   :  { %4475 = vst [vmem:[#allocation14 + $0x18] sm:$0xff] %v5989_v0 }
 0x781   :  { %v5111_v1 = vpop.f32.mrb[24].mxu0 }
 0x782   :  { %6167 = shalt.err (!%p6164_p4)
}
 0x783   :  { %s6168_s11 = scalar_lea.hbm %s6497_s10, 128 }
 0x784   :  { %p6169_p5 = scmp.ne.s32.totalorder %s6497_s10, %s6168_s11  ;;  %p6172_p6 = scmp.lt.u32.totalorder %s6168_s11, %s6497_s10 }
 0x786   :  { %p6174_p7 = pnand %p6172_p6, %p6169_p5 }
 0x788   :  { %6177 = shalt.err (!%p6174_p7)
}
 0x789   :  { %4499 = dma.vmem_to_hbm [thread:$0]  %s4497_s25, 128, %s6497_s10, [#allocation16]   ;;  %v5112_v2 = vpop.f32.mrb[25].mxu0  ;;  %v2943_v41 = vsub.s32 6, %v6384_v21  ;;  %v2935_v16 = vsub.s32 4, %v6384_v21  ;;  %v2939_v19 = vsub.s32 5, %v6384_v21 }
 0x78a   :  { %v5113_v3 = vadd.f32 %v5112_v2, %v5111_v1  ;;  %v5114_v4 = vpop.f32.mrb[26].mxu0  ;;  %s6230_s10 = smov [#allocation14]  }
 0x78b   :  { %v5115_v5 = vpop.f32.mrb[27].mxu0  ;;  %v2944_v44 = vrot.slane %v6447_v34, %v2943_v41  ;;  %v2936_v20 = vrot.slane %v6447_v34, %v2935_v16  ;;  %v2940_v24 = vrot.slane %v6447_v34, %v2939_v19  ;;  %s4486_s14 = sshll.u32 %s6230_s10, 4  ;;  %s4487_s14 = int_to_ptr.vmem [resolvable:$true] %s4486_s14 }
 0x78c   :  { %s6178_s19 = scalar_lea.vmem %s4487_s14, 896  ;;  %p6183_p9 = scmp.lt.s32.totalorder %s4487_s14, %s4487_s14 }
 0x78d   :  { %v4385_v47 = vadd.f32 %v5113_v3, %v2944_v44  ;;  %p6179_p8 = scmp.ne.s32.totalorder %s4487_s14, %s6178_s19  ;;  %p6184_p10 = scmp.lt.s32.totalorder %s6178_s19, %s6178_s19 }
 0x78f   :  { %p6185_p11 = por %p6184_p10, %p6183_p9 }
 0x791   :  { %p6186_p12 = pnand %p6185_p11, %p6179_p8 }
 0x7a1   :  { %v5133_v6 = vpop.f32.mrb[28].mxu0 }
 0x7a2   :  { %v5134_v7 = vpop.f32.mrb[29].mxu0 }
 0x7a3   :  { %v5135_v8 = vadd.f32 %v5134_v7, %v5133_v6  ;;  %v5136_v9 = vpop.f32.mrb[30].mxu0 }
 0x7a4   :  { %v5137_v10 = vpop.f32.mrb[31].mxu0 }
 0x7a5   :  { %v4425_v11 = vadd.f32 %v5135_v8, %v4385_v47 }
 0x7a7   :  { %v5039_v12 = vmul.f32 -1.442695, %v4425_v11 }
 0x7a9   :  { %5990 = vpow2.f32 %v5039_v12 }
 0x7b3   :  { %v5991_v13 = vpop.eup %5990 }
 0x7b4   :  { %v4457_v14 = vadd.f32 1.0, %v5991_v13 }
 0x7b6   :  { %5992 = vrcp.f32 %v4457_v14 }
 0x7c0   :  { %v5993_v15 = vpop.eup %5992 }
 0x7c1   :  { %4478 = vst [vmem:[#allocation14 + $0x30] sm:$0xff] %v5993_v15 }
 0x7e0   :  { %v4343_v25 = vpop.f32.mrb[20].mxu1 }
 0x7e1   :  { %v5175_v27 = vadd.f32 %v4343_v25, %v2936_v20  ;;  %v4345_v28 = vpop.f32.mrb[21].mxu1 }
 0x7e2   :  { %v5176_v29 = vadd.f32 %v4345_v28, %v2940_v24  ;;  %v4347_v30 = vpop.f32.mrb[22].mxu1 }
 0x7e3   :  { %v5037_v31 = vmul.f32 -1.442695, %v5175_v27  ;;  %v4348_v32 = vpop.f32.mrb[23].mxu1 }
 0x7e4   :  { %v5038_v33 = vmul.f32 -1.442695, %v5176_v29 }
 0x7e5   :  { %5994 = vpow2.f32 %v5037_v31 }
 0x7e6   :  { %5996 = vpow2.f32 %v5038_v33 }
 0x7ef   :  { %v5995_v35 = vpop.eup %5994 }
 0x7f0   :  { %v5997_v36 = vpop.eup %5996  ;;  %v4455_v39 = vadd.f32 1.0, %v5995_v35 }
 0x7f1   :  { %v4456_v40 = vadd.f32 1.0, %v5997_v36 }
 0x7f2   :  { %5998 = vrcp.f32 %v4455_v39 }
 0x7f3   :  { %6000 = vrcp.f32 %v4456_v40 }
 0x7fc   :  { %v5999_v21 = vpop.eup %5998 }
 0x7fd   :  { %v6001_v34 = vpop.eup %6000  ;;  %4476 = vst [vmem:[#allocation14 + $0x20] sm:$0xff] %v5999_v21 }
 0x7fe   :  { %4477 = vst [vmem:[#allocation14 + $0x28] sm:$0xff] %v6001_v34 }
 0x7ff   :  { %6189 = shalt.err (!%p6186_p12)
}
 0x800   :  { %s6190_s15 = scalar_lea.hbm %s6496_s9, 896 }
 0x801   :  { %p6191_p13 = scmp.ne.s32.totalorder %s6496_s9, %s6190_s15  ;;  %p6194_p0 = scmp.lt.u32.totalorder %s6190_s15, %s6496_s9 }
 0x803   :  { %p6196_p1 = pnand %p6194_p0, %p6191_p13 }
 0x805   :  { %6199 = shalt.err (!%p6196_p1)
}
 0x806   :  { %4489 = dma.vmem_to_hbm [thread:$0]  %s4487_s14, 896, %s6496_s9, [#allocation4]  }
 0x807   :  { %6208 = dma.done.wait [#allocation4], 896  }
 0x808   :  { %6209 = vsyncadd [#allocation4], 4294966400 }
 0x809   :  { %6210 = dma.done.wait [#allocation16], 128  }
 0x80a   :  { %6211 = vsyncadd [#allocation16], 4294967168 }
 0x80b   :  { %4506 = vsyncpa [#allocation3], 1 }
 0x80c   :  { %4507 = vsyncpa [#allocation6], 1 }
 0x80d   :  { %4508 = vsyncpa [#allocation9], 1 }
 0x80e   :  { %4509 = vsyncpa [#allocation12], 1 }
 0x80f   :  { %4510 = vsyncpa [#allocation4], 1 }
 0x810   :  { %4511 = vsyncpa [#allocation16], 1 }

</bundles_post_ra>
